<compile_context>
chip_gen: v7x
topology: tpu7x:2x2x1
jax: 0.10.0
libtpu: 0.0.40
codegen_flags: <defaults>
</compile_context>

<pallas_src>
import jax
import jax.numpy as jnp
from jax.experimental import pallas as pl
from jax.experimental.pallas import tpu as pltpu


_LANE = 128
_SUBLANE = 8


def _round_up(n, m):
    return ((n + m - 1) // m) * m


def _cdiv(a, b):
    return (a + b - 1) // b


def _pad2d(a, rows, cols):
    return jnp.pad(a, ((0, rows - a.shape[0]), (0, cols - a.shape[1])))


def _generic_block_kernel(
    x_ref,
    w1_ref, b1_ref,
    w2_ref, b2_ref,
    w3_ref, b3_ref,
    w4_ref, b4_ref,
    wt_ref,                    # fused [theta_b | theta_f] projection, no bias
    wbc_ref, bbc_ref,          # backcast head
    wfc_ref, bfc_ref,          # forecast head
    back_ref, fore_ref,        # two lane-dense outputs
):
    f32 = jnp.float32
    cdt = wt_ref.dtype  # matmul-operand dtype (bf16)

    def fc_relu(h, w_ref, b_ref):
        y = jnp.dot(h, w_ref[...], preferred_element_type=f32) + b_ref[...]
        return jnp.maximum(y, 0.0).astype(cdt)

    # 4 stacked FC + ReLU layers (Block.forward)
    h = fc_relu(x_ref[...], w1_ref, b1_ref)
    h = fc_relu(h, w2_ref, b2_ref)
    h = fc_relu(h, w3_ref, b3_ref)
    h = fc_relu(h, w4_ref, b4_ref)

    # fused theta projections (bias=False): theta = [theta_b | theta_f]
    theta = jnp.dot(h, wt_ref[...], preferred_element_type=f32).astype(cdt)
    T = wbc_ref.shape[0]                 # lane-aligned split point
    theta_b = theta[:, :T]
    theta_f = theta[:, T:]

    # split output heads (no zero-padded K-passes), two unmasked vst streams
    back = jnp.dot(theta_b, wbc_ref[...], preferred_element_type=f32) + bbc_ref[...]
    fore = jnp.dot(theta_f, wfc_ref[...], preferred_element_type=f32) + bfc_ref[...]
    back_ref[...] = back.astype(back_ref.dtype)
    fore_ref[...] = fore.astype(fore_ref.dtype)


def generic_block_forward(x, params, *, tile_b=512,
                          compute_dtype=jnp.bfloat16, out_dtype=jnp.float32):
    """GenericBlock forward.

    x: [B, backcast_length] float32
    params: dict of f32 weights/biases, weights stored [in, out]
            (i.e. pre-transposed so y = x @ W + b == torch's x @ W.T + b).
    tile_b: target batch tile (sweepable; 512-1024 on v5e/v6e, 256-512/core v7x).
    out_dtype: dtype of the stored backcast/forecast (f32 default, bf16 ok).
    """
    B, backcast_length = x.shape
    units = params["w1"].shape[1]
    thetas_dim = params["wtb"].shape[1]
    forecast_length = params["wfc"].shape[1]

    # lane-dense padded feature dims
    L = _round_up(backcast_length, _LANE)
    U = _round_up(units, _LANE)
    T = _round_up(thetas_dim, _LANE)
    F = _round_up(forecast_length, _LANE)

    # ---- batch tiling: divisor-aware tile, then guarantee >=2 grid steps ----
    tb_target = max(_SUBLANE, min(tile_b, _round_up(B, _SUBLANE)))
    n_tiles = _cdiv(B, tb_target)
    tb = _round_up(_cdiv(B, n_tiles), _SUBLANE)
    B_pad = _round_up(B, tb)
    if B_pad // tb < 2 and tb > _SUBLANE:
        # let the "parallel" batch axis shard across v7x's two TensorCores
        tb = _round_up(max(_SUBLANE, tb // 2), _SUBLANE)
        B_pad = _round_up(B, tb)
    grid = (B_pad // tb,)

    # ---- host-side prep: zero-pad, fuse thetas, cast matmul operands ----
    wd = compute_dtype
    f32 = jnp.float32
    w1 = _pad2d(params["w1"], L, U).astype(wd)
    w2 = _pad2d(params["w2"], U, U).astype(wd)
    w3 = _pad2d(params["w3"], U, U).astype(wd)
    w4 = _pad2d(params["w4"], U, U).astype(wd)
    b1 = _pad2d(params["b1"], 1, U).astype(f32)
    b2 = _pad2d(params["b2"], 1, U).astype(f32)
    b3 = _pad2d(params["b3"], 1, U).astype(f32)
    b4 = _pad2d(params["b4"], 1, U).astype(f32)

    # fused theta projection: [U, 2T] = [wtb_pad | wtf_pad] (both halves dense)
    wt = jnp.concatenate(
        [_pad2d(params["wtb"], U, T), _pad2d(params["wtf"], U, T)], axis=1
    ).astype(wd)

    # separate (dense) output heads
    wbc = _pad2d(params["wbc"], T, L).astype(wd)
    bbc = _pad2d(params["bbc"], 1, L).astype(f32)
    wfc = _pad2d(params["wfc"], T, F).astype(wd)
    bfc = _pad2d(params["bfc"], 1, F).astype(f32)

    xp = _pad2d(x, B_pad, L).astype(wd)

    # ---- generation-aware VMEM cap ----
    try:
        vmem_capacity = int(pltpu.get_tpu_info().vmem_capacity_bytes)
    except Exception:
        vmem_capacity = 64 << 20  # conservative (v7x per-TensorCore)
    vmem_cap = int(vmem_capacity * 0.8)  # ~102 MiB on v5e/v6e, ~51 MiB on v7x

    wbytes = jnp.dtype(wd).itemsize
    out_bytes = jnp.dtype(out_dtype).itemsize
    weight_elems = (w1.size + w2.size + w3.size + w4.size
                    + wt.size + wbc.size + wfc.size)

    def vmem_estimate(weight_buffers):
        weight_b = weight_buffers * weight_elems * wbytes
        # (1, N) f32 bias blocks occupy 8 sublanes each in VMEM
        bias_b = weight_buffers * _SUBLANE * 4 * (4 * U + L + F)
        stream_b = 2 * tb * L * wbytes + 2 * tb * (L + F) * out_bytes
        interm_b = tb * (2 * U + 2 * T + L + F) * 4  # f32 intermediates
        return weight_b + bias_b + stream_b + interm_b + (4 << 20)

    def build(single_buffer_weights):
        def const_spec(shape):
            nd = len(shape)

            def idx(i):
                return (0,) * nd

            if single_buffer_weights:
                return pl.BlockSpec(shape, idx, pipeline_mode=pl.Buffered(1))
            return pl.BlockSpec(shape, idx)

        in_specs = [
            pl.BlockSpec((tb, L), lambda i: (i, 0)),            # x tile
            const_spec(w1.shape), const_spec(b1.shape),
            const_spec(w2.shape), const_spec(b2.shape),
            const_spec(w3.shape), const_spec(b3.shape),
            const_spec(w4.shape), const_spec(b4.shape),
            const_spec(wt.shape),
            const_spec(wbc.shape), const_spec(bbc.shape),
            const_spec(wfc.shape), const_spec(bfc.shape),
        ]
        out_specs = (
            pl.BlockSpec((tb, L), lambda i: (i, 0)),
            pl.BlockSpec((tb, F), lambda i: (i, 0)),
        )

        est = vmem_estimate(1 if single_buffer_weights else 2)
        vmem_limit = min(vmem_cap, max(int(est), 32 << 20))
        compiler_params = pltpu.CompilerParams(
            dimension_semantics=("parallel",),
            vmem_limit_bytes=vmem_limit,
        )

        return pl.pallas_call(
            _generic_block_kernel,
            out_shape=(jax.ShapeDtypeStruct((B_pad, L), out_dtype),
                       jax.ShapeDtypeStruct((B_pad, F), out_dtype)),
            grid=grid,
            in_specs=in_specs,
            out_specs=out_specs,
            compiler_params=compiler_params,
        )

    args = (xp, w1, b1, w2, b2, w3, b3, w4, b4, wt, wbc, bbc, wfc, bfc)
    try:
        out_b, out_f = build(single_buffer_weights=True)(*args)
    except Exception:
        # fall back to default double-buffered weight specs
        out_b, out_f = build(single_buffer_weights=False)(*args)

    backcast = out_b[:B, :backcast_length]
    forecast = out_f[:B, :forecast_length]
    return backcast, forecast


def init_params(key, units, thetas_dim, backcast_length, forecast_length):
    """Deterministic synthetic init. Weights stored as [in, out] (pre-transposed)."""
    keys = jax.random.split(key, 14)

    def lin(k, fan_in, fan_out):
        bound = 1.0 / jnp.sqrt(fan_in)
        return jax.random.uniform(k, (fan_in, fan_out), jnp.float32, -bound, bound)

    def bias(k, fan_in, fan_out):
        bound = 1.0 / jnp.sqrt(fan_in)
        return jax.random.uniform(k, (1, fan_out), jnp.float32, -bound, bound)

    return dict(
        w1=lin(keys[0], backcast_length, units), b1=bias(keys[1], backcast_length, units),
        w2=lin(keys[2], units, units),           b2=bias(keys[3], units, units),
        w3=lin(keys[4], units, units),           b3=bias(keys[5], units, units),
        w4=lin(keys[6], units, units),           b4=bias(keys[7], units, units),
        wtb=lin(keys[8], units, thetas_dim),     # theta_b_fc, bias=False
        wtf=lin(keys[9], units, thetas_dim),     # theta_f_fc, bias=False
        wbc=lin(keys[10], thetas_dim, backcast_length),
        bbc=bias(keys[11], thetas_dim, backcast_length),
        wfc=lin(keys[12], thetas_dim, forecast_length),
        bfc=bias(keys[13], thetas_dim, forecast_length),
    )


def reference_forward(x, p):
    """Pure-JAX f32 reference reproducing GenericBlock.forward."""
    h = jax.nn.relu(x @ p["w1"] + p["b1"])
    h = jax.nn.relu(h @ p["w2"] + p["b2"])
    h = jax.nn.relu(h @ p["w3"] + p["b3"])
    h = jax.nn.relu(h @ p["w4"] + p["b4"])
    theta_b = h @ p["wtb"]
    theta_f = h @ p["wtf"]
    backcast = theta_b @ p["wbc"] + p["bbc"]
    forecast = theta_f @ p["wfc"] + p["bfc"]
    return backcast, forecast


if __name__ == "__main__":
    # Small shapes consistent with the module defaults (slightly scaled).
    B = 8
    backcast_length = 16
    forecast_length = 8
    units = 32
    thetas_dim = 8

    key = jax.random.PRNGKey(0)
    k_x, k_p = jax.random.split(key)

    # GenericBlock accepts [B, L] or [B, L, 1]; squeeze_last_dim handled here.
    x = jax.random.normal(k_x, (B, backcast_length, 1), jnp.float32)
    x2d = x[..., 0] if (x.ndim == 3 and x.shape[-1] == 1) else x

    params = init_params(k_p, units, thetas_dim, backcast_length, forecast_length)

    backcast, forecast = generic_block_forward(x2d, params, tile_b=512)
    backcast = jax.block_until_ready(backcast)
    forecast = jax.block_until_ready(forecast)

    ref_b, ref_f = reference_forward(x2d, params)
    assert backcast.shape == (B, backcast_length)
    assert forecast.shape == (B, forecast_length)
    # bf16 matmul operands -> bf16-appropriate tolerances vs the f32 reference
    assert jnp.allclose(backcast, ref_b, atol=5e-2, rtol=5e-2)
    assert jnp.allclose(forecast, ref_f, atol=5e-2, rtol=5e-2)

    print("KERNEL_OK")
</pallas_src>

<mosaic_0001>
module attributes {stable_mosaic.version = 11 : i64} {
  func.func @_generic_block_kernel(%arg0: i32, %arg1: memref<8x128xbf16, #tpu.memory_space<vmem>>, %arg2: memref<128x128xbf16, #tpu.memory_space<vmem>>, %arg3: memref<1x128xf32, #tpu.memory_space<vmem>>, %arg4: memref<128x128xbf16, #tpu.memory_space<vmem>>, %arg5: memref<1x128xf32, #tpu.memory_space<vmem>>, %arg6: memref<128x128xbf16, #tpu.memory_space<vmem>>, %arg7: memref<1x128xf32, #tpu.memory_space<vmem>>, %arg8: memref<128x128xbf16, #tpu.memory_space<vmem>>, %arg9: memref<1x128xf32, #tpu.memory_space<vmem>>, %arg10: memref<128x256xbf16, #tpu.memory_space<vmem>>, %arg11: memref<128x128xbf16, #tpu.memory_space<vmem>>, %arg12: memref<1x128xf32, #tpu.memory_space<vmem>>, %arg13: memref<128x128xbf16, #tpu.memory_space<vmem>>, %arg14: memref<1x128xf32, #tpu.memory_space<vmem>>, %arg15: memref<8x128xf32, #tpu.memory_space<vmem>>, %arg16: memref<8x128xf32, #tpu.memory_space<vmem>>) attributes {dimension_semantics = [#tpu.dimension_semantics<parallel>], iteration_bounds = array<i64: 1>, scalar_prefetch = 0 : i64, scratch_operands = 0 : i64, tpu.core_type = #tpu.core_type<tc>, window_params = [{transform_indices = @transform_0, window_bounds = array<i64: 8, 128>}, {pipeline_mode = #tpu.pipeline_mode<synchronous>, transform_indices = @transform_1, window_bounds = array<i64: 128, 128>}, {pipeline_mode = #tpu.pipeline_mode<synchronous>, transform_indices = @transform_2, window_bounds = array<i64: 1, 128>}, {pipeline_mode = #tpu.pipeline_mode<synchronous>, transform_indices = @transform_3, window_bounds = array<i64: 128, 128>}, {pipeline_mode = #tpu.pipeline_mode<synchronous>, transform_indices = @transform_4, window_bounds = array<i64: 1, 128>}, {pipeline_mode = #tpu.pipeline_mode<synchronous>, transform_indices = @transform_5, window_bounds = array<i64: 128, 128>}, {pipeline_mode = #tpu.pipeline_mode<synchronous>, transform_indices = @transform_6, window_bounds = array<i64: 1, 128>}, {pipeline_mode = #tpu.pipeline_mode<synchronous>, transform_indices = @transform_7, window_bounds = array<i64: 128, 128>}, {pipeline_mode = #tpu.pipeline_mode<synchronous>, transform_indices = @transform_8, window_bounds = array<i64: 1, 128>}, {pipeline_mode = #tpu.pipeline_mode<synchronous>, transform_indices = @transform_9, window_bounds = array<i64: 128, 256>}, {pipeline_mode = #tpu.pipeline_mode<synchronous>, transform_indices = @transform_10, window_bounds = array<i64: 128, 128>}, {pipeline_mode = #tpu.pipeline_mode<synchronous>, transform_indices = @transform_11, window_bounds = array<i64: 1, 128>}, {pipeline_mode = #tpu.pipeline_mode<synchronous>, transform_indices = @transform_12, window_bounds = array<i64: 128, 128>}, {pipeline_mode = #tpu.pipeline_mode<synchronous>, transform_indices = @transform_13, window_bounds = array<i64: 1, 128>}, {transform_indices = @transform_14, window_bounds = array<i64: 8, 128>}, {transform_indices = @transform_15, window_bounds = array<i64: 8, 128>}]} {
    %c0 = arith.constant 0 : index
    %c0_0 = arith.constant 0 : index
    %0 = vector.load %arg1[%c0, %c0_0] : memref<8x128xbf16, #tpu.memory_space<vmem>>, vector<8x128xbf16>
    %c0_1 = arith.constant 0 : index
    %c0_2 = arith.constant 0 : index
    %1 = vector.load %arg2[%c0_1, %c0_2] : memref<128x128xbf16, #tpu.memory_space<vmem>>, vector<128x128xbf16>
    %cst = arith.constant dense<0.000000e+00> : vector<8x128xf32>
    %2 = tpu.matmul %0, %1, %cst {dimension_numbers = #tpu.dot_dimension_numbers<[1], [0], [0], [1], [0, 0, 1, 1], [], []>} : vector<8x128xbf16>, vector<128x128xbf16>, vector<8x128xf32> -> vector<8x128xf32>
    %c0_3 = arith.constant 0 : index
    %c0_4 = arith.constant 0 : index
    %3 = vector.load %arg3[%c0_3, %c0_4] : memref<1x128xf32, #tpu.memory_space<vmem>>, vector<1x128xf32>
    %4 = vector.broadcast %3 : vector<1x128xf32> to vector<8x128xf32>
    %5 = arith.addf %2, %4 : vector<8x128xf32>
    %cst_5 = arith.constant 0.000000e+00 : f32
    %6 = vector.broadcast %cst_5 : f32 to vector<8x128xf32>
    %7 = arith.maximumf %5, %6 : vector<8x128xf32>
    %8 = arith.truncf %7 : vector<8x128xf32> to vector<8x128xbf16>
    %c0_6 = arith.constant 0 : index
    %c0_7 = arith.constant 0 : index
    %9 = vector.load %arg4[%c0_6, %c0_7] : memref<128x128xbf16, #tpu.memory_space<vmem>>, vector<128x128xbf16>
    %cst_8 = arith.constant dense<0.000000e+00> : vector<8x128xf32>
    %10 = tpu.matmul %8, %9, %cst_8 {dimension_numbers = #tpu.dot_dimension_numbers<[1], [0], [0], [1], [0, 0, 1, 1], [], []>} : vector<8x128xbf16>, vector<128x128xbf16>, vector<8x128xf32> -> vector<8x128xf32>
    %c0_9 = arith.constant 0 : index
    %c0_10 = arith.constant 0 : index
    %11 = vector.load %arg5[%c0_9, %c0_10] : memref<1x128xf32, #tpu.memory_space<vmem>>, vector<1x128xf32>
    %12 = vector.broadcast %11 : vector<1x128xf32> to vector<8x128xf32>
    %13 = arith.addf %10, %12 : vector<8x128xf32>
    %cst_11 = arith.constant 0.000000e+00 : f32
    %14 = vector.broadcast %cst_11 : f32 to vector<8x128xf32>
    %15 = arith.maximumf %13, %14 : vector<8x128xf32>
    %16 = arith.truncf %15 : vector<8x128xf32> to vector<8x128xbf16>
    %c0_12 = arith.constant 0 : index
    %c0_13 = arith.constant 0 : index
    %17 = vector.load %arg6[%c0_12, %c0_13] : memref<128x128xbf16, #tpu.memory_space<vmem>>, vector<128x128xbf16>
    %cst_14 = arith.constant dense<0.000000e+00> : vector<8x128xf32>
    %18 = tpu.matmul %16, %17, %cst_14 {dimension_numbers = #tpu.dot_dimension_numbers<[1], [0], [0], [1], [0, 0, 1, 1], [], []>} : vector<8x128xbf16>, vector<128x128xbf16>, vector<8x128xf32> -> vector<8x128xf32>
    %c0_15 = arith.constant 0 : index
    %c0_16 = arith.constant 0 : index
    %19 = vector.load %arg7[%c0_15, %c0_16] : memref<1x128xf32, #tpu.memory_space<vmem>>, vector<1x128xf32>
    %20 = vector.broadcast %19 : vector<1x128xf32> to vector<8x128xf32>
    %21 = arith.addf %18, %20 : vector<8x128xf32>
    %cst_17 = arith.constant 0.000000e+00 : f32
    %22 = vector.broadcast %cst_17 : f32 to vector<8x128xf32>
    %23 = arith.maximumf %21, %22 : vector<8x128xf32>
    %24 = arith.truncf %23 : vector<8x128xf32> to vector<8x128xbf16>
    %c0_18 = arith.constant 0 : index
    %c0_19 = arith.constant 0 : index
    %25 = vector.load %arg8[%c0_18, %c0_19] : memref<128x128xbf16, #tpu.memory_space<vmem>>, vector<128x128xbf16>
    %cst_20 = arith.constant dense<0.000000e+00> : vector<8x128xf32>
    %26 = tpu.matmul %24, %25, %cst_20 {dimension_numbers = #tpu.dot_dimension_numbers<[1], [0], [0], [1], [0, 0, 1, 1], [], []>} : vector<8x128xbf16>, vector<128x128xbf16>, vector<8x128xf32> -> vector<8x128xf32>
    %c0_21 = arith.constant 0 : index
    %c0_22 = arith.constant 0 : index
    %27 = vector.load %arg9[%c0_21, %c0_22] : memref<1x128xf32, #tpu.memory_space<vmem>>, vector<1x128xf32>
    %28 = vector.broadcast %27 : vector<1x128xf32> to vector<8x128xf32>
    %29 = arith.addf %26, %28 : vector<8x128xf32>
    %cst_23 = arith.constant 0.000000e+00 : f32
    %30 = vector.broadcast %cst_23 : f32 to vector<8x128xf32>
    %31 = arith.maximumf %29, %30 : vector<8x128xf32>
    %32 = arith.truncf %31 : vector<8x128xf32> to vector<8x128xbf16>
    %c0_24 = arith.constant 0 : index
    %c0_25 = arith.constant 0 : index
    %33 = vector.load %arg10[%c0_24, %c0_25] : memref<128x256xbf16, #tpu.memory_space<vmem>>, vector<128x256xbf16>
    %cst_26 = arith.constant dense<0.000000e+00> : vector<8x256xf32>
    %34 = tpu.matmul %32, %33, %cst_26 {dimension_numbers = #tpu.dot_dimension_numbers<[1], [0], [0], [1], [0, 0, 1, 1], [], []>} : vector<8x128xbf16>, vector<128x256xbf16>, vector<8x256xf32> -> vector<8x256xf32>
    %35 = arith.truncf %34 : vector<8x256xf32> to vector<8x256xbf16>
    %36 = vector.extract_strided_slice %35 {offsets = [0, 0], sizes = [8, 128], strides = [1, 1]} : vector<8x256xbf16> to vector<8x128xbf16>
    %37 = vector.extract_strided_slice %35 {offsets = [0, 128], sizes = [8, 128], strides = [1, 1]} : vector<8x256xbf16> to vector<8x128xbf16>
    %c0_27 = arith.constant 0 : index
    %c0_28 = arith.constant 0 : index
    %38 = vector.load %arg11[%c0_27, %c0_28] : memref<128x128xbf16, #tpu.memory_space<vmem>>, vector<128x128xbf16>
    %cst_29 = arith.constant dense<0.000000e+00> : vector<8x128xf32>
    %39 = tpu.matmul %36, %38, %cst_29 {dimension_numbers = #tpu.dot_dimension_numbers<[1], [0], [0], [1], [0, 0, 1, 1], [], []>} : vector<8x128xbf16>, vector<128x128xbf16>, vector<8x128xf32> -> vector<8x128xf32>
    %c0_30 = arith.constant 0 : index
    %c0_31 = arith.constant 0 : index
    %40 = vector.load %arg12[%c0_30, %c0_31] : memref<1x128xf32, #tpu.memory_space<vmem>>, vector<1x128xf32>
    %41 = vector.broadcast %40 : vector<1x128xf32> to vector<8x128xf32>
    %42 = arith.addf %39, %41 : vector<8x128xf32>
    %c0_32 = arith.constant 0 : index
    %c0_33 = arith.constant 0 : index
    %43 = vector.load %arg13[%c0_32, %c0_33] : memref<128x128xbf16, #tpu.memory_space<vmem>>, vector<128x128xbf16>
    %cst_34 = arith.constant dense<0.000000e+00> : vector<8x128xf32>
    %44 = tpu.matmul %37, %43, %cst_34 {dimension_numbers = #tpu.dot_dimension_numbers<[1], [0], [0], [1], [0, 0, 1, 1], [], []>} : vector<8x128xbf16>, vector<128x128xbf16>, vector<8x128xf32> -> vector<8x128xf32>
    %c0_35 = arith.constant 0 : index
    %c0_36 = arith.constant 0 : index
    %45 = vector.load %arg14[%c0_35, %c0_36] : memref<1x128xf32, #tpu.memory_space<vmem>>, vector<1x128xf32>
    %46 = vector.broadcast %45 : vector<1x128xf32> to vector<8x128xf32>
    %47 = arith.addf %44, %46 : vector<8x128xf32>
    %c0_37 = arith.constant 0 : index
    %c0_38 = arith.constant 0 : index
    %48 = vector.load %arg15[%c0_37, %c0_38] : memref<8x128xf32, #tpu.memory_space<vmem>>, vector<8x128xf32>
    tpu.vector_store %arg15[%c0_37, %c0_38], %42 {strides = array<i32>} : memref<8x128xf32, #tpu.memory_space<vmem>>, vector<8x128xf32>,
    %c0_39 = arith.constant 0 : index
    %c0_40 = arith.constant 0 : index
    %49 = vector.load %arg16[%c0_39, %c0_40] : memref<8x128xf32, #tpu.memory_space<vmem>>, vector<8x128xf32>
    tpu.vector_store %arg16[%c0_39, %c0_40], %47 {strides = array<i32>} : memref<8x128xf32, #tpu.memory_space<vmem>>, vector<8x128xf32>,
    return
  }
  func.func @transform_0(%arg0: i32) -> (i32, i32) {
    %c0_i32 = arith.constant 0 : i32
    %c0_i32_0 = arith.constant 0 : i32
    return %arg0, %c0_i32 : i32, i32
  }
  func.func @transform_1(%arg0: i32) -> (i32, i32) {
    %c0_i32 = arith.constant 0 : i32
    %c0_i32_0 = arith.constant 0 : i32
    %c0_i32_1 = arith.constant 0 : i32
    return %c0_i32, %c0_i32_0 : i32, i32
  }
  func.func @transform_2(%arg0: i32) -> (i32, i32) {
    %c0_i32 = arith.constant 0 : i32
    %c0_i32_0 = arith.constant 0 : i32
    %c0_i32_1 = arith.constant 0 : i32
    return %c0_i32, %c0_i32_0 : i32, i32
  }
  func.func @transform_3(%arg0: i32) -> (i32, i32) {
    %c0_i32 = arith.constant 0 : i32
    %c0_i32_0 = arith.constant 0 : i32
    %c0_i32_1 = arith.constant 0 : i32
    return %c0_i32, %c0_i32_0 : i32, i32
  }
  func.func @transform_4(%arg0: i32) -> (i32, i32) {
    %c0_i32 = arith.constant 0 : i32
    %c0_i32_0 = arith.constant 0 : i32
    %c0_i32_1 = arith.constant 0 : i32
    return %c0_i32, %c0_i32_0 : i32, i32
  }
  func.func @transform_5(%arg0: i32) -> (i32, i32) {
    %c0_i32 = arith.constant 0 : i32
    %c0_i32_0 = arith.constant 0 : i32
    %c0_i32_1 = arith.constant 0 : i32
    return %c0_i32, %c0_i32_0 : i32, i32
  }
  func.func @transform_6(%arg0: i32) -> (i32, i32) {
    %c0_i32 = arith.constant 0 : i32
    %c0_i32_0 = arith.constant 0 : i32
    %c0_i32_1 = arith.constant 0 : i32
    return %c0_i32, %c0_i32_0 : i32, i32
  }
  func.func @transform_7(%arg0: i32) -> (i32, i32) {
    %c0_i32 = arith.constant 0 : i32
    %c0_i32_0 = arith.constant 0 : i32
    %c0_i32_1 = arith.constant 0 : i32
    return %c0_i32, %c0_i32_0 : i32, i32
  }
  func.func @transform_8(%arg0: i32) -> (i32, i32) {
    %c0_i32 = arith.constant 0 : i32
    %c0_i32_0 = arith.constant 0 : i32
    %c0_i32_1 = arith.constant 0 : i32
    return %c0_i32, %c0_i32_0 : i32, i32
  }
  func.func @transform_9(%arg0: i32) -> (i32, i32) {
    %c0_i32 = arith.constant 0 : i32
    %c0_i32_0 = arith.constant 0 : i32
    %c0_i32_1 = arith.constant 0 : i32
    return %c0_i32, %c0_i32_0 : i32, i32
  }
  func.func @transform_10(%arg0: i32) -> (i32, i32) {
    %c0_i32 = arith.constant 0 : i32
    %c0_i32_0 = arith.constant 0 : i32
    %c0_i32_1 = arith.constant 0 : i32
    return %c0_i32, %c0_i32_0 : i32, i32
  }
  func.func @transform_11(%arg0: i32) -> (i32, i32) {
    %c0_i32 = arith.constant 0 : i32
    %c0_i32_0 = arith.constant 0 : i32
    %c0_i32_1 = arith.constant 0 : i32
    return %c0_i32, %c0_i32_0 : i32, i32
  }
  func.func @transform_12(%arg0: i32) -> (i32, i32) {
    %c0_i32 = arith.constant 0 : i32
    %c0_i32_0 = arith.constant 0 : i32
    %c0_i32_1 = arith.constant 0 : i32
    return %c0_i32, %c0_i32_0 : i32, i32
  }
  func.func @transform_13(%arg0: i32) -> (i32, i32) {
    %c0_i32 = arith.constant 0 : i32
    %c0_i32_0 = arith.constant 0 : i32
    %c0_i32_1 = arith.constant 0 : i32
    return %c0_i32, %c0_i32_0 : i32, i32
  }
  func.func @transform_14(%arg0: i32) -> (i32, i32) {
    %c0_i32 = arith.constant 0 : i32
    %c0_i32_0 = arith.constant 0 : i32
    return %arg0, %c0_i32 : i32, i32
  }
  func.func @transform_15(%arg0: i32) -> (i32, i32) {
    %c0_i32 = arith.constant 0 : i32
    %c0_i32_0 = arith.constant 0 : i32
    return %arg0, %c0_i32 : i32, i32
  }
}

module attributes {stable_mosaic.version = 11 : i64} {
  func.func @_generic_block_kernel(%arg0: i32, %arg1: memref<8x128xbf16, #tpu.memory_space<vmem>>, %arg2: memref<128x128xbf16, #tpu.memory_space<vmem>>, %arg3: memref<1x128xf32, #tpu.memory_space<vmem>>, %arg4: memref<128x128xbf16, #tpu.memory_space<vmem>>, %arg5: memref<1x128xf32, #tpu.memory_space<vmem>>, %arg6: memref<128x128xbf16, #tpu.memory_space<vmem>>, %arg7: memref<1x128xf32, #tpu.memory_space<vmem>>, %arg8: memref<128x128xbf16, #tpu.memory_space<vmem>>, %arg9: memref<1x128xf32, #tpu.memory_space<vmem>>, %arg10: memref<128x256xbf16, #tpu.memory_space<vmem>>, %arg11: memref<128x128xbf16, #tpu.memory_space<vmem>>, %arg12: memref<1x128xf32, #tpu.memory_space<vmem>>, %arg13: memref<128x128xbf16, #tpu.memory_space<vmem>>, %arg14: memref<1x128xf32, #tpu.memory_space<vmem>>, %arg15: memref<8x128xf32, #tpu.memory_space<vmem>>, %arg16: memref<8x128xf32, #tpu.memory_space<vmem>>) attributes {dimension_semantics = [#tpu.dimension_semantics<parallel>], iteration_bounds = array<i64: 1>, scalar_prefetch = 0 : i64, scratch_operands = 0 : i64, tpu.core_type = #tpu.core_type<tc>, window_params = [{transform_indices = @transform_0, window_bounds = array<i64: 8, 128>}, {pipeline_mode = #tpu.pipeline_mode<synchronous>, transform_indices = @transform_1, window_bounds = array<i64: 128, 128>}, {pipeline_mode = #tpu.pipeline_mode<synchronous>, transform_indices = @transform_2, window_bounds = array<i64: 1, 128>}, {pipeline_mode = #tpu.pipeline_mode<synchronous>, transform_indices = @transform_3, window_bounds = array<i64: 128, 128>}, {pipeline_mode = #tpu.pipeline_mode<synchronous>, transform_indices = @transform_4, window_bounds = array<i64: 1, 128>}, {pipeline_mode = #tpu.pipeline_mode<synchronous>, transform_indices = @transform_5, window_bounds = array<i64: 128, 128>}, {pipeline_mode = #tpu.pipeline_mode<synchronous>, transform_indices = @transform_6, window_bounds = array<i64: 1, 128>}, {pipeline_mode = #tpu.pipeline_mode<synchronous>, transform_indices = @transform_7, window_bounds = array<i64: 128, 128>}, {pipeline_mode = #tpu.pipeline_mode<synchronous>, transform_indices = @transform_8, window_bounds = array<i64: 1, 128>}, {pipeline_mode = #tpu.pipeline_mode<synchronous>, transform_indices = @transform_9, window_bounds = array<i64: 128, 256>}, {pipeline_mode = #tpu.pipeline_mode<synchronous>, transform_indices = @transform_10, window_bounds = array<i64: 128, 128>}, {pipeline_mode = #tpu.pipeline_mode<synchronous>, transform_indices = @transform_11, window_bounds = array<i64: 1, 128>}, {pipeline_mode = #tpu.pipeline_mode<synchronous>, transform_indices = @transform_12, window_bounds = array<i64: 128, 128>}, {pipeline_mode = #tpu.pipeline_mode<synchronous>, transform_indices = @transform_13, window_bounds = array<i64: 1, 128>}, {transform_indices = @transform_14, window_bounds = array<i64: 8, 128>}, {transform_indices = @transform_15, window_bounds = array<i64: 8, 128>}]} {
    %c0 = arith.constant 0 : index
    %c0_0 = arith.constant 0 : index
    %0 = vector.load %arg1[%c0, %c0_0] : memref<8x128xbf16, #tpu.memory_space<vmem>>, vector<8x128xbf16>
    %c0_1 = arith.constant 0 : index
    %c0_2 = arith.constant 0 : index
    %1 = vector.load %arg2[%c0_1, %c0_2] : memref<128x128xbf16, #tpu.memory_space<vmem>>, vector<128x128xbf16>
    %cst = arith.constant dense<0.000000e+00> : vector<8x128xf32>
    %2 = tpu.matmul %0, %1, %cst {dimension_numbers = #tpu.dot_dimension_numbers<[1], [0], [0], [1], [0, 0, 1, 1], [], []>} : vector<8x128xbf16>, vector<128x128xbf16>, vector<8x128xf32> -> vector<8x128xf32>
    %c0_3 = arith.constant 0 : index
    %c0_4 = arith.constant 0 : index
    %3 = vector.load %arg3[%c0_3, %c0_4] : memref<1x128xf32, #tpu.memory_space<vmem>>, vector<1x128xf32>
    %4 = vector.broadcast %3 : vector<1x128xf32> to vector<8x128xf32>
    %5 = arith.addf %2, %4 : vector<8x128xf32>
    %cst_5 = arith.constant 0.000000e+00 : f32
    %6 = vector.broadcast %cst_5 : f32 to vector<8x128xf32>
    %7 = arith.maximumf %5, %6 : vector<8x128xf32>
    %8 = arith.truncf %7 : vector<8x128xf32> to vector<8x128xbf16>
    %c0_6 = arith.constant 0 : index
    %c0_7 = arith.constant 0 : index
    %9 = vector.load %arg4[%c0_6, %c0_7] : memref<128x128xbf16, #tpu.memory_space<vmem>>, vector<128x128xbf16>
    %cst_8 = arith.constant dense<0.000000e+00> : vector<8x128xf32>
    %10 = tpu.matmul %8, %9, %cst_8 {dimension_numbers = #tpu.dot_dimension_numbers<[1], [0], [0], [1], [0, 0, 1, 1], [], []>} : vector<8x128xbf16>, vector<128x128xbf16>, vector<8x128xf32> -> vector<8x128xf32>
    %c0_9 = arith.constant 0 : index
    %c0_10 = arith.constant 0 : index
    %11 = vector.load %arg5[%c0_9, %c0_10] : memref<1x128xf32, #tpu.memory_space<vmem>>, vector<1x128xf32>
    %12 = vector.broadcast %11 : vector<1x128xf32> to vector<8x128xf32>
    %13 = arith.addf %10, %12 : vector<8x128xf32>
    %cst_11 = arith.constant 0.000000e+00 : f32
    %14 = vector.broadcast %cst_11 : f32 to vector<8x128xf32>
    %15 = arith.maximumf %13, %14 : vector<8x128xf32>
    %16 = arith.truncf %15 : vector<8x128xf32> to vector<8x128xbf16>
    %c0_12 = arith.constant 0 : index
    %c0_13 = arith.constant 0 : index
    %17 = vector.load %arg6[%c0_12, %c0_13] : memref<128x128xbf16, #tpu.memory_space<vmem>>, vector<128x128xbf16>
    %cst_14 = arith.constant dense<0.000000e+00> : vector<8x128xf32>
    %18 = tpu.matmul %16, %17, %cst_14 {dimension_numbers = #tpu.dot_dimension_numbers<[1], [0], [0], [1], [0, 0, 1, 1], [], []>} : vector<8x128xbf16>, vector<128x128xbf16>, vector<8x128xf32> -> vector<8x128xf32>
    %c0_15 = arith.constant 0 : index
    %c0_16 = arith.constant 0 : index
    %19 = vector.load %arg7[%c0_15, %c0_16] : memref<1x128xf32, #tpu.memory_space<vmem>>, vector<1x128xf32>
    %20 = vector.broadcast %19 : vector<1x128xf32> to vector<8x128xf32>
    %21 = arith.addf %18, %20 : vector<8x128xf32>
    %cst_17 = arith.constant 0.000000e+00 : f32
    %22 = vector.broadcast %cst_17 : f32 to vector<8x128xf32>
    %23 = arith.maximumf %21, %22 : vector<8x128xf32>
    %24 = arith.truncf %23 : vector<8x128xf32> to vector<8x128xbf16>
    %c0_18 = arith.constant 0 : index
    %c0_19 = arith.constant 0 : index
    %25 = vector.load %arg8[%c0_18, %c0_19] : memref<128x128xbf16, #tpu.memory_space<vmem>>, vector<128x128xbf16>
    %cst_20 = arith.constant dense<0.000000e+00> : vector<8x128xf32>
    %26 = tpu.matmul %24, %25, %cst_20 {dimension_numbers = #tpu.dot_dimension_numbers<[1], [0], [0], [1], [0, 0, 1, 1], [], []>} : vector<8x128xbf16>, vector<128x128xbf16>, vector<8x128xf32> -> vector<8x128xf32>
    %c0_21 = arith.constant 0 : index
    %c0_22 = arith.constant 0 : index
    %27 = vector.load %arg9[%c0_21, %c0_22] : memref<1x128xf32, #tpu.memory_space<vmem>>, vector<1x128xf32>
    %28 = vector.broadcast %27 : vector<1x128xf32> to vector<8x128xf32>
    %29 = arith.addf %26, %28 : vector<8x128xf32>
    %cst_23 = arith.constant 0.000000e+00 : f32
    %30 = vector.broadcast %cst_23 : f32 to vector<8x128xf32>
    %31 = arith.maximumf %29, %30 : vector<8x128xf32>
    %32 = arith.truncf %31 : vector<8x128xf32> to vector<8x128xbf16>
    %c0_24 = arith.constant 0 : index
    %c0_25 = arith.constant 0 : index
    %33 = vector.load %arg10[%c0_24, %c0_25] : memref<128x256xbf16, #tpu.memory_space<vmem>>, vector<128x256xbf16>
    %cst_26 = arith.constant dense<0.000000e+00> : vector<8x256xf32>
    %34 = tpu.matmul %32, %33, %cst_26 {dimension_numbers = #tpu.dot_dimension_numbers<[1], [0], [0], [1], [0, 0, 1, 1], [], []>} : vector<8x128xbf16>, vector<128x256xbf16>, vector<8x256xf32> -> vector<8x256xf32>
    %35 = arith.truncf %34 : vector<8x256xf32> to vector<8x256xbf16>
    %36 = vector.extract_strided_slice %35 {offsets = [0, 0], sizes = [8, 128], strides = [1, 1]} : vector<8x256xbf16> to vector<8x128xbf16>
    %37 = vector.extract_strided_slice %35 {offsets = [0, 128], sizes = [8, 128], strides = [1, 1]} : vector<8x256xbf16> to vector<8x128xbf16>
    %c0_27 = arith.constant 0 : index
    %c0_28 = arith.constant 0 : index
    %38 = vector.load %arg11[%c0_27, %c0_28] : memref<128x128xbf16, #tpu.memory_space<vmem>>, vector<128x128xbf16>
    %cst_29 = arith.constant dense<0.000000e+00> : vector<8x128xf32>
    %39 = tpu.matmul %36, %38, %cst_29 {dimension_numbers = #tpu.dot_dimension_numbers<[1], [0], [0], [1], [0, 0, 1, 1], [], []>} : vector<8x128xbf16>, vector<128x128xbf16>, vector<8x128xf32> -> vector<8x128xf32>
    %c0_30 = arith.constant 0 : index
    %c0_31 = arith.constant 0 : index
    %40 = vector.load %arg12[%c0_30, %c0_31] : memref<1x128xf32, #tpu.memory_space<vmem>>, vector<1x128xf32>
    %41 = vector.broadcast %40 : vector<1x128xf32> to vector<8x128xf32>
    %42 = arith.addf %39, %41 : vector<8x128xf32>
    %c0_32 = arith.constant 0 : index
    %c0_33 = arith.constant 0 : index
    %43 = vector.load %arg13[%c0_32, %c0_33] : memref<128x128xbf16, #tpu.memory_space<vmem>>, vector<128x128xbf16>
    %cst_34 = arith.constant dense<0.000000e+00> : vector<8x128xf32>
    %44 = tpu.matmul %37, %43, %cst_34 {dimension_numbers = #tpu.dot_dimension_numbers<[1], [0], [0], [1], [0, 0, 1, 1], [], []>} : vector<8x128xbf16>, vector<128x128xbf16>, vector<8x128xf32> -> vector<8x128xf32>
    %c0_35 = arith.constant 0 : index
    %c0_36 = arith.constant 0 : index
    %45 = vector.load %arg14[%c0_35, %c0_36] : memref<1x128xf32, #tpu.memory_space<vmem>>, vector<1x128xf32>
    %46 = vector.broadcast %45 : vector<1x128xf32> to vector<8x128xf32>
    %47 = arith.addf %44, %46 : vector<8x128xf32>
    %c0_37 = arith.constant 0 : index
    %c0_38 = arith.constant 0 : index
    %48 = vector.load %arg15[%c0_37, %c0_38] : memref<8x128xf32, #tpu.memory_space<vmem>>, vector<8x128xf32>
    tpu.vector_store %arg15[%c0_37, %c0_38], %42 {strides = array<i32>} : memref<8x128xf32, #tpu.memory_space<vmem>>, vector<8x128xf32>,
    %c0_39 = arith.constant 0 : index
    %c0_40 = arith.constant 0 : index
    %49 = vector.load %arg16[%c0_39, %c0_40] : memref<8x128xf32, #tpu.memory_space<vmem>>, vector<8x128xf32>
    tpu.vector_store %arg16[%c0_39, %c0_40], %47 {strides = array<i32>} : memref<8x128xf32, #tpu.memory_space<vmem>>, vector<8x128xf32>,
    return
  }
  func.func @transform_0(%arg0: i32) -> (i32, i32) {
    %c0_i32 = arith.constant 0 : i32
    %c0_i32_0 = arith.constant 0 : i32
    return %arg0, %c0_i32 : i32, i32
  }
  func.func @transform_1(%arg0: i32) -> (i32, i32) {
    %c0_i32 = arith.constant 0 : i32
    %c0_i32_0 = arith.constant 0 : i32
    %c0_i32_1 = arith.constant 0 : i32
    return %c0_i32, %c0_i32_0 : i32, i32
  }
  func.func @transform_2(%arg0: i32) -> (i32, i32) {
    %c0_i32 = arith.constant 0 : i32
    %c0_i32_0 = arith.constant 0 : i32
    %c0_i32_1 = arith.constant 0 : i32
    return %c0_i32, %c0_i32_0 : i32, i32
  }
  func.func @transform_3(%arg0: i32) -> (i32, i32) {
    %c0_i32 = arith.constant 0 : i32
    %c0_i32_0 = arith.constant 0 : i32
    %c0_i32_1 = arith.constant 0 : i32
    return %c0_i32, %c0_i32_0 : i32, i32
  }
  func.func @transform_4(%arg0: i32) -> (i32, i32) {
    %c0_i32 = arith.constant 0 : i32
    %c0_i32_0 = arith.constant 0 : i32
    %c0_i32_1 = arith.constant 0 : i32
    return %c0_i32, %c0_i32_0 : i32, i32
  }
  func.func @transform_5(%arg0: i32) -> (i32, i32) {
    %c0_i32 = arith.constant 0 : i32
    %c0_i32_0 = arith.constant 0 : i32
    %c0_i32_1 = arith.constant 0 : i32
    return %c0_i32, %c0_i32_0 : i32, i32
  }
  func.func @transform_6(%arg0: i32) -> (i32, i32) {
    %c0_i32 = arith.constant 0 : i32
    %c0_i32_0 = arith.constant 0 : i32
    %c0_i32_1 = arith.constant 0 : i32
    return %c0_i32, %c0_i32_0 : i32, i32
  }
  func.func @transform_7(%arg0: i32) -> (i32, i32) {
    %c0_i32 = arith.constant 0 : i32
    %c0_i32_0 = arith.constant 0 : i32
    %c0_i32_1 = arith.constant 0 : i32
    return %c0_i32, %c0_i32_0 : i32, i32
  }
  func.func @transform_8(%arg0: i32) -> (i32, i32) {
    %c0_i32 = arith.constant 0 : i32
    %c0_i32_0 = arith.constant 0 : i32
    %c0_i32_1 = arith.constant 0 : i32
    return %c0_i32, %c0_i32_0 : i32, i32
  }
  func.func @transform_9(%arg0: i32) -> (i32, i32) {
    %c0_i32 = arith.constant 0 : i32
    %c0_i32_0 = arith.constant 0 : i32
    %c0_i32_1 = arith.constant 0 : i32
    return %c0_i32, %c0_i32_0 : i32, i32
  }
  func.func @transform_10(%arg0: i32) -> (i32, i32) {
    %c0_i32 = arith.constant 0 : i32
    %c0_i32_0 = arith.constant 0 : i32
    %c0_i32_1 = arith.constant 0 : i32
    return %c0_i32, %c0_i32_0 : i32, i32
  }
  func.func @transform_11(%arg0: i32) -> (i32, i32) {
    %c0_i32 = arith.constant 0 : i32
    %c0_i32_0 = arith.constant 0 : i32
    %c0_i32_1 = arith.constant 0 : i32
    return %c0_i32, %c0_i32_0 : i32, i32
  }
  func.func @transform_12(%arg0: i32) -> (i32, i32) {
    %c0_i32 = arith.constant 0 : i32
    %c0_i32_0 = arith.constant 0 : i32
    %c0_i32_1 = arith.constant 0 : i32
    return %c0_i32, %c0_i32_0 : i32, i32
  }
  func.func @transform_13(%arg0: i32) -> (i32, i32) {
    %c0_i32 = arith.constant 0 : i32
    %c0_i32_0 = arith.constant 0 : i32
    %c0_i32_1 = arith.constant 0 : i32
    return %c0_i32, %c0_i32_0 : i32, i32
  }
  func.func @transform_14(%arg0: i32) -> (i32, i32) {
    %c0_i32 = arith.constant 0 : i32
    %c0_i32_0 = arith.constant 0 : i32
    return %arg0, %c0_i32 : i32, i32
  }
  func.func @transform_15(%arg0: i32) -> (i32, i32) {
    %c0_i32 = arith.constant 0 : i32
    %c0_i32_0 = arith.constant 0 : i32
    return %arg0, %c0_i32 : i32, i32
  }
}

</mosaic_0001>

<bundles_post_ra>
// kernel: tpu_custom_call.1
= control target key start
LH: loop header
LB: loop body
LE: loop exit
PB: predicated region body
PF: predicated region fallthrough
CT: control target
= control target key end

     0   :  { %s1895_s0 = inlined_call_operand.hbm [shape: bf16[8,128], index: 0, kind: input, shape index: {}]   ;;  %s1896_s1 = inlined_call_operand.hbm [shape: bf16[128,128], index: 1, kind: input, shape index: {}]   ;;  %s1897_s2 = inlined_call_operand.vmem [shape: f32[1,128], index: 2, kind: input, shape index: {}]   ;;  %s1898_s3 = inlined_call_operand.hbm [shape: bf16[128,128], index: 3, kind: input, shape index: {}]   ;;  %s1899_s4 = inlined_call_operand.vmem [shape: f32[1,128], index: 4, kind: input, shape index: {}]   ;;  %s1900_s5 = inlined_call_operand.hbm [shape: bf16[128,128], index: 5, kind: input, shape index: {}]   ;;  %s1901_s6 = inlined_call_operand.vmem [shape: f32[1,128], index: 6, kind: input, shape index: {}]   ;;  %s1902_s7 = inlined_call_operand.hbm [shape: bf16[128,128], index: 7, kind: input, shape index: {}]   ;;  %s1903_s8 = inlined_call_operand.vmem [shape: f32[1,128], index: 8, kind: input, shape index: {}]   ;;  %s1904_s9 = inlined_call_operand.hbm [shape: bf16[128,256], index: 9, kind: input, shape index: {}]   ;;  %s1905_s10 = inlined_call_operand.hbm [shape: bf16[128,128], index: 10, kind: input, shape index: {}]   ;;  %s1906_s11 = inlined_call_operand.vmem [shape: f32[1,128], index: 11, kind: input, shape index: {}]   ;;  %s1907_s12 = inlined_call_operand.hbm [shape: bf16[128,128], index: 12, kind: input, shape index: {}]   ;;  %s1908_s13 = inlined_call_operand.vmem [shape: f32[1,128], index: 13, kind: input, shape index: {}]   ;;  %s1909_s14 = inlined_call_operand.hbm [shape: f32[8,128], index: 14, kind: output, shape index: {0}]   ;;  %s1910_s15 = inlined_call_operand.hbm [shape: f32[8,128], index: 15, kind: output, shape index: {1}]  }
   0x1   :  { %1912 = sst [smem:[#allocation26_spill]] %s1910_s15 }
   0x2   :  { %21 = vsyncpa [#allocation3], 0 }
   0x3   :  { %22 = vsyncpa [#allocation6], 0 }
   0x4   :  { %23 = vsyncpa [#allocation9], 0 }
   0x5   :  { %24 = vsyncpa [#allocation12], 0 }
   0x6   :  { %25 = vsyncpa [#allocation15], 0 }
   0x7   :  { %26 = vsyncpa [#allocation4], 0 }
   0x8   :  { %27 = vsyncpa [#allocation18], 0  ;;  %s1575_s18 = smov [#allocation5]   ;;  %s1341_s22 = scalar_lea.hbm %s1896_s1, 1024 }
   0x9   :  { %s43_s19 = sshll.u32 %s1575_s18, 4  ;;  %p1342_p0 = scmp.ne.s32.totalorder %s1896_s1, %s1341_s22  ;;  %s44_s19 = int_to_ptr.vmem [resolvable:$true] %s43_s19 }
   0xa   :  { %p1345_p1 = scmp.lt.u32.totalorder %s1341_s22, %s1896_s1 }
   0xc   :  { %p1347_p2 = pnand %p1345_p1, %p1342_p0 }
   0xe   :  { %1350 = shalt.err (!%p1347_p2)
}
   0xf   :  { %s1351_s27 = scalar_lea.vmem %s44_s19, 1024  ;;  %p1356_p4 = scmp.lt.s32.totalorder %s44_s19, %s44_s19 }
  0x10   :  { %p1352_p3 = scmp.ne.s32.totalorder %s44_s19, %s1351_s27  ;;  %p1357_p5 = scmp.lt.s32.totalorder %s1351_s27, %s1351_s27 }
  0x12   :  { %p1358_p6 = por %p1357_p5, %p1356_p4 }
  0x14   :  { %p1359_p7 = pnand %p1358_p6, %p1352_p3 }
  0x16   :  { %1362 = shalt.err (!%p1359_p7)
}
  0x17   :  { %s1576_s28 = smov 64   ;;  %s1577_s29 = smov 4  }
  0x18   :  { %49 = dma.hbm_to_vmem [thread:$0]  %s1896_s1, 1024, %s44_s19, [#allocation6], %s1576_s28, %s1576_s28, %s1577_s29  }
  0x19   :  { %s1578_s17 = smov [#allocation8]   ;;  %s1579_s20 = smov [#allocation11]  }
  0x1a   :  { %s71_s18 = sshll.u32 %s1578_s17, 4  ;;  %s99_s21 = sshll.u32 %s1579_s20, 4  ;;  %s72_s18 = int_to_ptr.vmem [resolvable:$true] %s71_s18  ;;  %s100_s21 = int_to_ptr.vmem [resolvable:$true] %s99_s21 }
  0x1b   :  { %s1363_s24 = scalar_lea.hbm %s1900_s5, 1024 }
  0x1c   :  { %p1364_p8 = scmp.ne.s32.totalorder %s1900_s5, %s1363_s24  ;;  %p1367_p9 = scmp.lt.u32.totalorder %s1363_s24, %s1900_s5 }
  0x1e   :  { %p1369_p10 = pnand %p1367_p9, %p1364_p8 }
  0x20   :  { %1372 = shalt.err (!%p1369_p10)
}
  0x21   :  { %s1373_s1 = scalar_lea.vmem %s72_s18, 1024  ;;  %p1378_p12 = scmp.lt.s32.totalorder %s72_s18, %s72_s18 }
  0x22   :  { %p1374_p11 = scmp.ne.s32.totalorder %s72_s18, %s1373_s1  ;;  %p1379_p13 = scmp.lt.s32.totalorder %s1373_s1, %s1373_s1 }
  0x24   :  { %p1380_p0 = por %p1379_p13, %p1378_p12 }
  0x26   :  { %p1381_p1 = pnand %p1380_p0, %p1374_p11 }
  0x28   :  { %1384 = shalt.err (!%p1381_p1)
}
  0x29   :  { %77 = dma.hbm_to_vmem [thread:$0]  %s1900_s5, 1024, %s72_s18, [#allocation9], %s1576_s28, %s1576_s28, %s1577_s29  }
  0x2a   :  { %s1385_s17 = scalar_lea.hbm %s1904_s9, 2048 }
  0x2b   :  { %p1386_p2 = scmp.ne.s32.totalorder %s1904_s9, %s1385_s17  ;;  %p1389_p3 = scmp.lt.u32.totalorder %s1385_s17, %s1904_s9 }
  0x2d   :  { %p1391_p4 = pnand %p1389_p3, %p1386_p2 }
  0x2f   :  { %1394 = shalt.err (!%p1391_p4)
}
  0x30   :  { %s1395_s25 = scalar_lea.vmem %s100_s21, 2048  ;;  %p1400_p6 = scmp.lt.s32.totalorder %s100_s21, %s100_s21 }
  0x31   :  { %p1396_p5 = scmp.ne.s32.totalorder %s100_s21, %s1395_s25  ;;  %p1401_p7 = scmp.lt.s32.totalorder %s1395_s25, %s1395_s25 }
  0x33   :  { %p1402_p8 = por %p1401_p7, %p1400_p6 }
  0x35   :  { %p1403_p9 = pnand %p1402_p8, %p1396_p5 }
  0x37   :  { %1406 = shalt.err (!%p1403_p9)
}
  0x38   :  { %s1580_s5 = smov 128   ;;  %s1581_s18 = smov 8  }
  0x39   :  { %105 = dma.hbm_to_vmem [thread:$0]  %s1904_s9, 2048, %s100_s21, [#allocation12], %s1580_s5, %s1580_s5, %s1581_s18  }
  0x3a   :  { %s1582_s1 = smov [#allocation2]   ;;  %s1583_s30 = smov [#allocation7]  }
  0x3b   :  { %s34_s19 = sshll.u32 %s1582_s1, 4  ;;  %s57_s16 = sshll.u32 %s1583_s30, 4  ;;  %s35_s19 = int_to_ptr.vmem [resolvable:$true] %s34_s19  ;;  %s58_s16 = int_to_ptr.vmem [resolvable:$true] %s57_s16 }
  0x3c   :  { %s1407_s20 = scalar_lea.hbm %s1895_s0, 64 }
  0x3d   :  { %p1408_p10 = scmp.ne.s32.totalorder %s1895_s0, %s1407_s20  ;;  %p1411_p11 = scmp.lt.u32.totalorder %s1407_s20, %s1895_s0 }
  0x3f   :  { %p1413_p12 = pnand %p1411_p11, %p1408_p10 }
  0x41   :  { %1416 = shalt.err (!%p1413_p12)
}
  0x42   :  { %s1417_s9 = scalar_lea.vmem %s35_s19, 64  ;;  %p1422_p0 = scmp.lt.s32.totalorder %s35_s19, %s35_s19 }
  0x43   :  { %p1418_p13 = scmp.ne.s32.totalorder %s35_s19, %s1417_s9  ;;  %p1423_p1 = scmp.lt.s32.totalorder %s1417_s9, %s1417_s9 }
  0x45   :  { %p1424_p2 = por %p1423_p1, %p1422_p0 }
  0x47   :  { %p1425_p3 = pnand %p1424_p2, %p1418_p13 }
  0x49   :  { %1428 = shalt.err (!%p1425_p3)
}
  0x4a   :  { %37 = dma.hbm_to_vmem [thread:$0]  %s1895_s0, 64, %s35_s19, [#allocation3]  }
  0x4b   :  { %s1429_s27 = scalar_lea.hbm %s1898_s3, 1024 }
  0x4c   :  { %p1430_p4 = scmp.ne.s32.totalorder %s1898_s3, %s1429_s27  ;;  %p1433_p5 = scmp.lt.u32.totalorder %s1429_s27, %s1898_s3 }
  0x4e   :  { %p1435_p6 = pnand %p1433_p5, %p1430_p4 }
  0x50   :  { %1438 = shalt.err (!%p1435_p6)
}
  0x51   :  { %s1439_s20 = scalar_lea.vmem %s58_s16, 1024  ;;  %p1444_p8 = scmp.lt.s32.totalorder %s58_s16, %s58_s16 }
  0x52   :  { %p1440_p7 = scmp.ne.s32.totalorder %s58_s16, %s1439_s20  ;;  %p1445_p9 = scmp.lt.s32.totalorder %s1439_s20, %s1439_s20 }
  0x54   :  { %p1446_p10 = por %p1445_p9, %p1444_p8 }
  0x56   :  { %p1447_p11 = pnand %p1446_p10, %p1440_p7 }
  0x58   :  { %1450 = shalt.err (!%p1447_p11)
}
  0x59   :  { %63 = dma.hbm_to_vmem [thread:$0]  %s1898_s3, 1024, %s58_s16, [#allocation6], %s1576_s28, %s1576_s28, %s1577_s29  }
  0x5a   :  { %s1584_s22 = smov [#allocation10]   ;;  %s1585_s24 = smov [#allocation13]  }
  0x5b   :  { %s85_s23 = sshll.u32 %s1584_s22, 4  ;;  %s111_s25 = sshll.u32 %s1585_s24, 4  ;;  %s86_s23 = int_to_ptr.vmem [resolvable:$true] %s85_s23  ;;  %s112_s25 = int_to_ptr.vmem [resolvable:$true] %s111_s25 }
  0x5c   :  { %s1451_s5 = scalar_lea.hbm %s1902_s7, 1024 }
  0x5d   :  { %p1452_p12 = scmp.ne.s32.totalorder %s1902_s7, %s1451_s5  ;;  %p1455_p13 = scmp.lt.u32.totalorder %s1451_s5, %s1902_s7 }
  0x5f   :  { %p1457_p0 = pnand %p1455_p13, %p1452_p12 }
  0x61   :  { %1460 = shalt.err (!%p1457_p0)
}
  0x62   :  { %s1461_s3 = scalar_lea.vmem %s86_s23, 1024  ;;  %p1466_p2 = scmp.lt.s32.totalorder %s86_s23, %s86_s23 }
  0x63   :  { %p1462_p1 = scmp.ne.s32.totalorder %s86_s23, %s1461_s3  ;;  %p1467_p3 = scmp.lt.s32.totalorder %s1461_s3, %s1461_s3 }
  0x65   :  { %p1468_p4 = por %p1467_p3, %p1466_p2 }
  0x67   :  { %p1469_p5 = pnand %p1468_p4, %p1462_p1 }
  0x69   :  { %1472 = shalt.err (!%p1469_p5)
}
  0x6a   :  { %91 = dma.hbm_to_vmem [thread:$0]  %s1902_s7, 1024, %s86_s23, [#allocation9], %s1576_s28, %s1576_s28, %s1577_s29  }
  0x6b   :  { %s1473_s20 = scalar_lea.hbm %s1905_s10, 1024 }
  0x6c   :  { %p1474_p6 = scmp.ne.s32.totalorder %s1905_s10, %s1473_s20  ;;  %p1477_p7 = scmp.lt.u32.totalorder %s1473_s20, %s1905_s10 }
  0x6e   :  { %p1479_p8 = pnand %p1477_p7, %p1474_p6 }
  0x70   :  { %1482 = shalt.err (!%p1479_p8)
}
  0x71   :  { %s1483_s9 = scalar_lea.vmem %s112_s25, 1024  ;;  %p1488_p10 = scmp.lt.s32.totalorder %s112_s25, %s112_s25 }
  0x72   :  { %p1484_p9 = scmp.ne.s32.totalorder %s112_s25, %s1483_s9  ;;  %p1489_p11 = scmp.lt.s32.totalorder %s1483_s9, %s1483_s9 }
  0x74   :  { %p1490_p12 = por %p1489_p11, %p1488_p10 }
  0x76   :  { %p1491_p13 = pnand %p1490_p12, %p1484_p9 }
  0x78   :  { %1494 = shalt.err (!%p1491_p13)
}
  0x79   :  { %117 = dma.hbm_to_vmem [thread:$0]  %s1905_s10, 1024, %s112_s25, [#allocation12], %s1576_s28, %s1576_s28, %s1577_s29  }
  0x7a   :  { %s1586_s21 = smov [#allocation14]   ;;  %s1495_s27 = scalar_lea.hbm %s1907_s12, 1024 }
  0x7b   :  { %s125_s5 = sshll.u32 %s1586_s21, 4  ;;  %p1496_p0 = scmp.ne.s32.totalorder %s1907_s12, %s1495_s27  ;;  %s126_s5 = int_to_ptr.vmem [resolvable:$true] %s125_s5 }
  0x7c   :  { %p1499_p1 = scmp.lt.u32.totalorder %s1495_s27, %s1907_s12 }
  0x7e   :  { %p1501_p2 = pnand %p1499_p1, %p1496_p0 }
  0x80   :  { %1504 = shalt.err (!%p1501_p2)
}
  0x81   :  { %s1505_s15 = scalar_lea.vmem %s126_s5, 1024  ;;  %p1510_p4 = scmp.lt.s32.totalorder %s126_s5, %s126_s5 }
  0x82   :  { %p1506_p3 = scmp.ne.s32.totalorder %s126_s5, %s1505_s15  ;;  %p1511_p5 = scmp.lt.s32.totalorder %s1505_s15, %s1505_s15 }
  0x84   :  { %p1512_p6 = por %p1511_p5, %p1510_p4 }
  0x86   :  { %p1513_p7 = pnand %p1512_p6, %p1506_p3 }
  0x88   :  { %1516 = shalt.err (!%p1513_p7)
}
  0x89   :  { %131 = dma.hbm_to_vmem [thread:$0]  %s1907_s12, 1024, %s126_s5, [#allocation15], %s1576_s28, %s1576_s28, %s1577_s29  }
  0x8a   :  { %1561 = dma.done.wait [#allocation3], 64  }
  0x8b   :  { %1562 = vsyncadd [#allocation3], 4294967232 }
  0x8c   :  { %1563 = dma.done.wait [#allocation6], 2048  }
  0x8d   :  { %1564 = vsyncadd [#allocation6], 4294965248 }
  0x8e   :  { %1565 = dma.done.wait [#allocation9], 2048  }
  0x8f   :  { %1566 = vsyncadd [#allocation9], 4294965248 }
  0x90   :  { %1567 = dma.done.wait [#allocation12], 3072  }
  0x91   :  { %1568 = vsyncadd [#allocation12], 4294964224 }
  0x92   :  { %1569 = dma.done.wait [#allocation15], 1024  }
  0x93   :  { %1570 = vsyncadd [#allocation15], 4294966272  ;;  %v1587_v0 = vmov 0.0   ;;  %vm1588_vm0 = vmmov 0   ;;  %v1269_v1 = vld [vmem:[#allocation5] sm:$0xff]   ;;  %v1270_v2 = vld [vmem:[#allocation5 + $0x8] sm:$0xff]  }
  0x94   :  { %1132 = vmatprep.subr.bf16.mxu0 %v1587_v0  ;;  %1148 = vmatprep.mubr.msk.bf16.mxu0 %vm1588_vm0, %v1587_v0  ;;  %v1271_v3 = vld [vmem:[#allocation5 + $0x10] sm:$0xff]   ;;  %v1277_v4 = vld [vmem:[#allocation7] sm:$0xff]   ;;  %v1272_v5 = vld [vmem:[#allocation5 + $0x18] sm:$0xff]   ;;  %s1590_s19 = smov [#allocation16]   ;;  %s1591_s7 = smov [#allocation17]  }
  0x95   :  { %1152 = vmatprep.subr.bf16.mxu1 %v1587_v0  ;;  %1168 = vmatprep.mubr.msk.bf16.mxu1 %vm1588_vm0, %v1587_v0  ;;  %v1278_v6 = vld [vmem:[#allocation7 + $0x8] sm:$0xff]   ;;  %v1273_v7 = vld [vmem:[#allocation5 + $0x20] sm:$0xff]   ;;  %v1279_v8 = vld [vmem:[#allocation7 + $0x10] sm:$0xff]   ;;  %s981_s22 = sshll.u32 %s1590_s19, 4  ;;  %s991_s23 = sshll.u32 %s1591_s7, 4  ;;  %s982_s22 = int_to_ptr.vmem [resolvable:$true] %s981_s22  ;;  %s1864_s23 = int_to_ptr.vmem [resolvable:$true] %s991_s23 }
  0x96   :  { %1133 = vmatpush3.bf16.msra.mxu0 %v1269_v1  ;;  %1153 = vmatpush3.bf16.msra.mxu1 %v1277_v4  ;;  %v1274_v9 = vld [vmem:[#allocation5 + $0x28] sm:$0xff]   ;;  %v1280_v10 = vld [vmem:[#allocation7 + $0x18] sm:$0xff]   ;;  %v1275_v11 = vld [vmem:[#allocation5 + $0x30] sm:$0xff]   ;;  %p1522_p9 = scmp.lt.s32.totalorder %s982_s22, %s982_s22 }
  0x97   :  { %1134 = vmatprep.subr.bf16.mxu0 %v1587_v0  ;;  %1154 = vmatprep.subr.bf16.mxu1 %v1587_v0  ;;  %v1281_v12 = vld [vmem:[#allocation7 + $0x20] sm:$0xff]   ;;  %v1276_v13 = vld [vmem:[#allocation5 + $0x38] sm:$0xff]   ;;  %v1282_v14 = vld [vmem:[#allocation7 + $0x28] sm:$0xff]  }
  0x98   :  { %v159_v15 = vld [vmem:[#allocation2] sm:$0xf]  ;;  %v1283_v16 = vld [vmem:[#allocation7 + $0x30] sm:$0xff]   ;;  %v1285_v18 = vld [vmem:[#allocation8] sm:$0xff]  }
  0x99   :  { %v1284_v17 = vld [vmem:[#allocation7 + $0x38] sm:$0xff]   ;;  %v1286_v19 = vld [vmem:[#allocation8 + $0x8] sm:$0xff]   ;;  %v1287_v20 = vld [vmem:[#allocation8 + $0x10] sm:$0xff]  }
  0x9a   :  { %1135 = vmatpush3.bf16.msra.mxu0 %v1270_v2  ;;  %1155 = vmatpush3.bf16.msra.mxu1 %v1278_v6  ;;  %v1288_v21 = vld [vmem:[#allocation8 + $0x18] sm:$0xff]   ;;  %v1289_v22 = vld [vmem:[#allocation8 + $0x20] sm:$0xff]   ;;  %v1290_v23 = vld [vmem:[#allocation8 + $0x28] sm:$0xff]  }
  0x9b   :  { %1136 = vmatprep.subr.bf16.mxu0 %v1587_v0  ;;  %1156 = vmatprep.subr.bf16.mxu1 %v1587_v0  ;;  %v1008_v24 = vld [vmem:[%s1897_s2] ss:$0 sm:$0xff]  ;;  %v1291_v32 = vld [vmem:[#allocation8 + $0x30] sm:$0xff]   ;;  %v1293_v34 = vld [vmem:[#allocation10] sm:$0xff]  }
  0x9c   :  { %v1292_v33 = vld [vmem:[#allocation8 + $0x38] sm:$0xff]   ;;  %v1294_v35 = vld [vmem:[#allocation10 + $0x8] sm:$0xff]   ;;  %v1295_v36 = vld [vmem:[#allocation10 + $0x10] sm:$0xff]  }
  0x9d   :  { %v1296_v37 = vld [vmem:[#allocation10 + $0x18] sm:$0xff]   ;;  %v1297_v38 = vld [vmem:[#allocation10 + $0x20] sm:$0xff]   ;;  %v1298_v39 = vld [vmem:[#allocation10 + $0x28] sm:$0xff]  }
  0x9e   :  { %1137 = vmatpush3.bf16.msra.mxu0 %v1271_v3  ;;  %1157 = vmatpush3.bf16.msra.mxu1 %v1279_v8  ;;  %v1017_v40 = vld [vmem:[%s1899_s4] ss:$0 sm:$0xff]  ;;  %v1299_v48 = vld [vmem:[#allocation10 + $0x30] sm:$0xff]   ;;  %v1301_v50 = vld [vmem:[#allocation11] ss:$8 sps:$4 sm:$0xff]  }
  0x9f   :  { %1138 = vmatprep.subr.bf16.mxu0 %v1587_v0  ;;  %1158 = vmatprep.subr.bf16.mxu1 %v1587_v0  ;;  %v1300_v49 = vld [vmem:[#allocation10 + $0x38] sm:$0xff]   ;;  %v1303_v51 = vld [vmem:[#allocation11 + $0x4] ss:$8 sps:$4 sm:$0xff]   ;;  %v1307_v55 = vld [vmem:[#allocation11 + $0x20] ss:$8 sps:$4 sm:$0xff]  }
  0xa0   :  { %v1306_v52 = vld [vmem:[#allocation11 + $0x14] ss:$8 sps:$4 sm:$0xff]   ;;  %v1304_v53 = vld [vmem:[#allocation11 + $0x10] ss:$8 sps:$4 sm:$0xff]   ;;  %v1309_v54 = vld [vmem:[#allocation11 + $0x24] ss:$8 sps:$4 sm:$0xff]  }
  0xa1   :  { %v1312_v56 = vld [vmem:[#allocation11 + $0x34] ss:$8 sps:$4 sm:$0xff]   ;;  %v1310_v57 = vld [vmem:[#allocation11 + $0x30] ss:$8 sps:$4 sm:$0xff]   ;;  %v1315_v58 = vld [vmem:[#allocation11 + $0x44] ss:$8 sps:$4 sm:$0xff]  }
  0xa2   :  { %1139 = vmatpush3.bf16.msra.mxu0 %v1272_v5  ;;  %1159 = vmatpush3.bf16.msra.mxu1 %v1280_v10  ;;  %v1313_v59 = vld [vmem:[#allocation11 + $0x40] ss:$8 sps:$4 sm:$0xff]   ;;  %v1318_v60 = vld [vmem:[#allocation11 + $0x54] ss:$8 sps:$4 sm:$0xff]   ;;  %v1316_v61 = vld [vmem:[#allocation11 + $0x50] ss:$8 sps:$4 sm:$0xff]  }
  0xa3   :  { %1140 = vmatprep.subr.bf16.mxu0 %v1587_v0  ;;  %1160 = vmatprep.subr.bf16.mxu1 %v1587_v0  ;;  %v1321_v62 = vld [vmem:[#allocation11 + $0x64] ss:$8 sps:$4 sm:$0xff]   ;;  %v1319_v63 = vld [vmem:[#allocation11 + $0x60] ss:$8 sps:$4 sm:$0xff]   ;;  %v1026_v1 = vld [vmem:[%s1901_s6] ss:$0 sm:$0xff] }
  0xa4   :  { %v1322_v10 = vld [vmem:[#allocation11 + $0x70] ss:$8 sps:$4 sm:$0xff]  }
  0xa6   :  { %1141 = vmatpush3.bf16.msra.mxu0 %v1273_v7  ;;  %1161 = vmatpush3.bf16.msra.mxu1 %v1281_v12  ;;  %v1325_v12 = vld [vmem:[#allocation13] sm:$0xff]  }
  0xa7   :  { %1142 = vmatprep.subr.bf16.mxu0 %v1587_v0  ;;  %1162 = vmatprep.subr.bf16.mxu1 %v1587_v0 }
  0xaa   :  { %1143 = vmatpush3.bf16.msra.mxu0 %v1274_v9  ;;  %1163 = vmatpush3.bf16.msra.mxu1 %v1282_v14  ;;  %v1324_v9 = vld [vmem:[#allocation11 + $0x74] ss:$8 sps:$4 sm:$0xff]  }
  0xab   :  { %1144 = vmatprep.subr.bf16.mxu0 %v1587_v0  ;;  %1164 = vmatprep.subr.bf16.mxu1 %v1587_v0  ;;  %v1329_v14 = vld [vmem:[#allocation13 + $0x10] sm:$0xff]  }
  0xae   :  { %1145 = vmatpush3.bf16.msra.mxu0 %v1275_v11  ;;  %1165 = vmatpush3.bf16.msra.mxu1 %v1283_v16  ;;  %v1589_v11 = vmov 0   ;;  %v1333_v16 = vld [vmem:[#allocation13 + $0x20] sm:$0xff]  }
  0xaf   :  { %1146 = vmatprep.subr.bf16.mxu0 %v1587_v0  ;;  %1166 = vmatprep.subr.bf16.mxu1 %v1587_v0 }
  0xb2   :  { %1147 = vmatpush3.bf16.msra.mxu0 %v1276_v13  ;;  %1167 = vmatpush3.bf16.msra.mxu1 %v1284_v17  ;;  %v1327_v13 = vld [vmem:[#allocation13 + $0x8] sm:$0xff]  }
  0xb3   :  { %1172 = vmatprep.subr.bf16.mxu0 %v1587_v0  ;;  %1192 = vmatprep.subr.bf16.mxu1 %v1587_v0  ;;  %v1335_v17 = vld [vmem:[#allocation13 + $0x28] sm:$0xff]  }
  0xb5   :  { %1149 = vmatmul.mubr.bf16.vlgmr.msra.gmra.mrb[0].mxu0 %v159_v15  ;;  %v1331_v15 = vld [vmem:[#allocation13 + $0x18] sm:$0xff]  }
  0xb6   :  { %1188 = vmatprep.mubr.msk.bf16.mxu0 %vm1588_vm0, %v1587_v0  ;;  %1173 = vmatpush3.bf16.msra.mxu0 %v1285_v18  ;;  %v1337_v18 = vld [vmem:[#allocation13 + $0x30] sm:$0xff]  }
  0xb7   :  { %1174 = vmatprep.subr.bf16.mxu0 %v1587_v0 }
  0xba   :  { %1175 = vmatpush3.bf16.msra.mxu0 %v1286_v19  ;;  %v1035_v19 = vld [vmem:[%s1903_s8] ss:$0 sm:$0xff] }
  0xbb   :  { %1176 = vmatprep.subr.bf16.mxu0 %v1587_v0 }
  0xbe   :  { %1177 = vmatpush3.bf16.msra.mxu0 %v1287_v20 }
  0xbf   :  { %1178 = vmatprep.subr.bf16.mxu0 %v1587_v0 }
  0xc2   :  { %1179 = vmatpush3.bf16.msra.mxu0 %v1288_v21 }
  0xc3   :  { %1180 = vmatprep.subr.bf16.mxu0 %v1587_v0 }
  0xc6   :  { %1181 = vmatpush3.bf16.msra.mxu0 %v1289_v22 }
  0xc7   :  { %1182 = vmatprep.subr.bf16.mxu0 %v1587_v0 }
  0xca   :  { %1183 = vmatpush3.bf16.msra.mxu0 %v1290_v23 }
  0xcb   :  { %1184 = vmatprep.subr.bf16.mxu0 %v1587_v0 }
  0xce   :  { %1185 = vmatpush3.bf16.msra.mxu0 %v1291_v32  ;;  %v1336_v32 = vld [vmem:[#allocation14 + $0x28] sm:$0xff]  }
  0xcf   :  { %1186 = vmatprep.subr.bf16.mxu0 %v1587_v0 }
  0xd2   :  { %1187 = vmatpush3.bf16.msra.mxu0 %v1292_v33  ;;  %v1338_v33 = vld [vmem:[#allocation14 + $0x30] sm:$0xff]  }
  0xd3   :  { %708 = vmatprep.subr.bf16.mxu0 %v1303_v51 }
 0x188   :  { %v265_v25 = vpop.f32.mrb[0].mxu0 }
 0x189   :  { %v266_v26 = vadd.f32 %v1008_v24, %v265_v25  ;;  %v1150_v27 = vpop.f32.mrb[1].mxu0 }
 0x18a   :  { %v268_v28 = vpop.f32.mrb[2].mxu0 }
 0x18b   :  { %v271_v29 = vmax.f32 %v266_v26, 0.0  ;;  %v1151_v30 = vpop.f32.mrb[3].mxu0  ;;  %v1326_v26 = vld [vmem:[#allocation14] sm:$0xff]   ;;  %v1328_v28 = vld [vmem:[#allocation14 + $0x8] sm:$0xff]  }
 0x18c   :  { %v1332_v30 = vld [vmem:[#allocation14 + $0x18] sm:$0xff]  }
 0x18d   :  { %v272_v31 = vpack.c.bf16 %v271_v29, %v271_v29  ;;  %v1330_v29 = vld [vmem:[#allocation14 + $0x10] sm:$0xff]  }
 0x18f   :  { %1169 = vmatmul.mubr.bf16.vlgmr.msra.gmra.mrb[0].mxu1 %v272_v31  ;;  %v1334_v31 = vld [vmem:[#allocation14 + $0x20] sm:$0xff]  }
 0x190   :  { %1208 = vmatprep.mubr.msk.bf16.mxu1 %vm1588_vm0, %v1587_v0  ;;  %1193 = vmatpush3.bf16.msra.mxu1 %v1293_v34  ;;  %v1339_v34 = vld [vmem:[#allocation13 + $0x38] sm:$0xff]  }
 0x191   :  { %1194 = vmatprep.subr.bf16.mxu1 %v1587_v0 }
 0x194   :  { %1195 = vmatpush3.bf16.msra.mxu1 %v1294_v35  ;;  %v1340_v35 = vld [vmem:[#allocation14 + $0x38] sm:$0xff]  }
 0x195   :  { %1196 = vmatprep.subr.bf16.mxu1 %v1587_v0 }
 0x198   :  { %1197 = vmatpush3.bf16.msra.mxu1 %v1295_v36 }
 0x199   :  { %1198 = vmatprep.subr.bf16.mxu1 %v1587_v0 }
 0x19c   :  { %1199 = vmatpush3.bf16.msra.mxu1 %v1296_v37 }
 0x19d   :  { %1200 = vmatprep.subr.bf16.mxu1 %v1587_v0 }
 0x1a0   :  { %1201 = vmatpush3.bf16.msra.mxu1 %v1297_v38 }
 0x1a1   :  { %1202 = vmatprep.subr.bf16.mxu1 %v1587_v0 }
 0x1a4   :  { %1203 = vmatpush3.bf16.msra.mxu1 %v1298_v39 }
 0x1a5   :  { %1204 = vmatprep.subr.bf16.mxu1 %v1587_v0 }
 0x1a8   :  { %1205 = vmatpush3.bf16.msra.mxu1 %v1299_v48 }
 0x1a9   :  { %1206 = vmatprep.subr.bf16.mxu1 %v1587_v0 }
 0x1ac   :  { %1207 = vmatpush3.bf16.msra.mxu1 %v1300_v49 }
 0x1ad   :  { %1212 = vmatprep.subr.bf16.mxu1 %v1587_v0 }
 0x262   :  { %v378_v41 = vpop.f32.mrb[0].mxu1 }
 0x263   :  { %v379_v42 = vadd.f32 %v1017_v40, %v378_v41  ;;  %v1170_v43 = vpop.f32.mrb[1].mxu1 }
 0x264   :  { %v381_v44 = vpop.f32.mrb[2].mxu1 }
 0x265   :  { %v384_v45 = vmax.f32 %v379_v42, 0.0  ;;  %v1171_v46 = vpop.f32.mrb[3].mxu1  ;;  %v1060_v42 = vld [vmem:[%s1906_s11] ss:$0 sm:$0xff]  ;;  %s1517_s11 = scalar_lea.vmem %s982_s22, 128 }
 0x266   :  { %p1518_p8 = scmp.ne.s32.totalorder %s982_s22, %s1517_s11  ;;  %p1523_p10 = scmp.lt.s32.totalorder %s1517_s11, %s1517_s11 }
 0x267   :  { %v385_v47 = vpack.c.bf16 %v384_v45, %v384_v45 }
 0x268   :  { %p1524_p11 = por %p1523_p10, %p1522_p9 }
 0x269   :  { %1189 = vmatmul.mubr.bf16.vlgmr.msra.gmra.mrb[4].mxu0 %v385_v47 }
 0x26a   :  { %709 = vmatpush1.bf16.msra.mxu0 %v1301_v50  ;;  %740 = vmatprep.mubr.bf16.mxu0 %v1589_v11  ;;  %p1525_p12 = pnand %p1524_p11, %p1518_p8 }
 0x26b   :  { %710 = vmatprep.subr.bf16.mxu0 %v1306_v52 }
 0x26e   :  { %711 = vmatpush1.bf16.msra.mxu0 %v1304_v53 }
 0x26f   :  { %712 = vmatprep.subr.bf16.mxu0 %v1309_v54 }
 0x272   :  { %713 = vmatpush1.bf16.msra.mxu0 %v1307_v55 }
 0x273   :  { %714 = vmatprep.subr.bf16.mxu0 %v1312_v56 }
 0x276   :  { %715 = vmatpush1.bf16.msra.mxu0 %v1310_v57 }
 0x277   :  { %716 = vmatprep.subr.bf16.mxu0 %v1315_v58 }
 0x27a   :  { %717 = vmatpush1.bf16.msra.mxu0 %v1313_v59 }
 0x27b   :  { %718 = vmatprep.subr.bf16.mxu0 %v1318_v60 }
 0x27e   :  { %719 = vmatpush1.bf16.msra.mxu0 %v1316_v61 }
 0x27f   :  { %720 = vmatprep.subr.bf16.mxu0 %v1321_v62 }
 0x282   :  { %721 = vmatpush1.bf16.msra.mxu0 %v1319_v63 }
 0x283   :  { %722 = vmatprep.subr.bf16.mxu0 %v1324_v9 }
 0x286   :  { %723 = vmatpush1.bf16.msra.mxu0 %v1322_v10 }
 0x287   :  { %1232 = vmatprep.subr.bf16.mxu0 %v1587_v0 }
 0x33c   :  { %v491_v2 = vpop.f32.mrb[4].mxu0 }
 0x33d   :  { %v492_v3 = vadd.f32 %v1026_v1, %v491_v2  ;;  %v1190_v4 = vpop.f32.mrb[5].mxu0 }
 0x33e   :  { %v494_v5 = vpop.f32.mrb[6].mxu0 }
 0x33f   :  { %v497_v6 = vmax.f32 %v492_v3, 0.0  ;;  %v1191_v7 = vpop.f32.mrb[7].mxu0 }
 0x341   :  { %v498_v8 = vpack.c.bf16 %v497_v6, %v497_v6 }
 0x343   :  { %1209 = vmatmul.mubr.bf16.vlgmr.msra.gmra.mrb[4].mxu1 %v498_v8 }
 0x344   :  { %1228 = vmatprep.mubr.msk.bf16.mxu1 %vm1588_vm0, %v1587_v0  ;;  %1213 = vmatpush3.bf16.msra.mxu1 %v1325_v12 }
 0x345   :  { %1214 = vmatprep.subr.bf16.mxu1 %v1587_v0 }
 0x348   :  { %1215 = vmatpush3.bf16.msra.mxu1 %v1327_v13 }
 0x349   :  { %1216 = vmatprep.subr.bf16.mxu1 %v1587_v0 }
 0x34c   :  { %1217 = vmatpush3.bf16.msra.mxu1 %v1329_v14 }
 0x34d   :  { %1218 = vmatprep.subr.bf16.mxu1 %v1587_v0 }
 0x350   :  { %1219 = vmatpush3.bf16.msra.mxu1 %v1331_v15 }
 0x351   :  { %1220 = vmatprep.subr.bf16.mxu1 %v1587_v0 }
 0x354   :  { %1221 = vmatpush3.bf16.msra.mxu1 %v1333_v16 }
 0x355   :  { %1222 = vmatprep.subr.bf16.mxu1 %v1587_v0 }
 0x358   :  { %1223 = vmatpush3.bf16.msra.mxu1 %v1335_v17 }
 0x359   :  { %1224 = vmatprep.subr.bf16.mxu1 %v1587_v0 }
 0x35c   :  { %1225 = vmatpush3.bf16.msra.mxu1 %v1337_v18 }
 0x35d   :  { %1226 = vmatprep.subr.bf16.mxu1 %v1587_v0 }
 0x360   :  { %1227 = vmatpush3.bf16.msra.mxu1 %v1339_v34 }
 0x416   :  { %v604_v20 = vpop.f32.mrb[4].mxu1 }
 0x417   :  { %v605_v21 = vadd.f32 %v1035_v19, %v604_v20  ;;  %v1210_v22 = vpop.f32.mrb[5].mxu1 }
 0x418   :  { %v607_v23 = vpop.f32.mrb[6].mxu1 }
 0x419   :  { %v610_v24 = vmax.f32 %v605_v21, 0.0  ;;  %v1211_v25 = vpop.f32.mrb[7].mxu1 }
 0x41b   :  { %v611_v27 = vpack.c.bf16 %v610_v24, %v610_v24 }
 0x41d   :  { %741 = vmatmul.mubr.bf16.vlgmr.msra.gmra.mrb[8].mxu0 %v611_v27 }
 0x41e   :  { %1233 = vmatpush3.bf16.msra.mxu0 %v1326_v26  ;;  %1248 = vmatprep.mubr.msk.bf16.mxu0 %vm1588_vm0, %v1587_v0 }
 0x41f   :  { %1234 = vmatprep.subr.bf16.mxu0 %v1587_v0 }
 0x422   :  { %1235 = vmatpush3.bf16.msra.mxu0 %v1328_v28 }
 0x423   :  { %1236 = vmatprep.subr.bf16.mxu0 %v1587_v0 }
 0x426   :  { %1237 = vmatpush3.bf16.msra.mxu0 %v1330_v29 }
 0x427   :  { %1238 = vmatprep.subr.bf16.mxu0 %v1587_v0 }
 0x42a   :  { %1239 = vmatpush3.bf16.msra.mxu0 %v1332_v30 }
 0x42b   :  { %1240 = vmatprep.subr.bf16.mxu0 %v1587_v0 }
 0x42e   :  { %1241 = vmatpush3.bf16.msra.mxu0 %v1334_v31 }
 0x42f   :  { %1242 = vmatprep.subr.bf16.mxu0 %v1587_v0 }
 0x432   :  { %1243 = vmatpush3.bf16.msra.mxu0 %v1336_v32 }
 0x433   :  { %1244 = vmatprep.subr.bf16.mxu0 %v1587_v0 }
 0x436   :  { %1245 = vmatpush3.bf16.msra.mxu0 %v1338_v33 }
 0x437   :  { %1246 = vmatprep.subr.bf16.mxu0 %v1587_v0  ;;  %v1069_v0 = vld [vmem:[%s1908_s13] ss:$0 sm:$0xff] }
 0x43a   :  { %1247 = vmatpush3.bf16.msra.mxu0 %v1340_v35 }
 0x4f0   :  { %v742_v36 = vpop.f32.mrb[8].mxu0 }
 0x4f1   :  { %v749_v37 = vpack.c.bf16 %v742_v36, %v742_v36  ;;  %v744_v38 = vpop.f32.mrb[9].mxu0 }
 0x4f2   :  { %v750_v39 = vpack.c.bf16 %v744_v38, %v744_v38  ;;  %v746_v40 = vpop.f32.mrb[10].mxu0 }
 0x4f3   :  { %v747_v41 = vpop.f32.mrb[11].mxu0  ;;  %1229 = vmatmul.mubr.bf16.vlgmr.msra.gmra.mrb[8].mxu1 %v749_v37 }
 0x4f4   :  { %1249 = vmatmul.mubr.bf16.vlgmr.msra.gmra.mrb[12].mxu0 %v750_v39 }
 0x5c6   :  { %v856_v43 = vpop.f32.mrb[8].mxu1 }
 0x5c7   :  { %v857_v44 = vadd.f32 %v1060_v42, %v856_v43  ;;  %v1230_v45 = vpop.f32.mrb[9].mxu1  ;;  %v967_v46 = vpop.f32.mrb[12].mxu0 }
 0x5c8   :  { %v968_v47 = vadd.f32 %v1069_v0, %v967_v46  ;;  %v859_v48 = vpop.f32.mrb[10].mxu1  ;;  %v1250_v49 = vpop.f32.mrb[13].mxu0 }
 0x5c9   :  { %973 = vst [vmem:[#allocation16] sm:$0xff] %v857_v44  ;;  %v1231_v50 = vpop.f32.mrb[11].mxu1  ;;  %v970_v51 = vpop.f32.mrb[14].mxu0 }
 0x5ca   :  { %974 = vst [vmem:[#allocation17] sm:$0xff] %v968_v47  ;;  %v1251_v52 = vpop.f32.mrb[15].mxu0 }
 0x5cb   :  { %1528 = shalt.err (!%p1525_p12)
}
 0x5cc   :  { %s1529_s5 = scalar_lea.hbm %s1909_s14, 128 }
 0x5cd   :  { %p1530_p13 = scmp.ne.s32.totalorder %s1909_s14, %s1529_s5  ;;  %p1533_p0 = scmp.lt.u32.totalorder %s1529_s5, %s1909_s14 }
 0x5cf   :  { %p1535_p1 = pnand %p1533_p0, %p1530_p13 }
 0x5d1   :  { %1538 = shalt.err (!%p1535_p1)
}
 0x5d2   :  { %984 = dma.vmem_to_hbm [thread:$0]  %s982_s22, 128, %s1909_s14, [#allocation4]  }
 0x5d3   :  { %s1539_s30 = scalar_lea.vmem %s1864_s23, 128  ;;  %p1544_p3 = scmp.lt.s32.totalorder %s1864_s23, %s1864_s23 }
 0x5d4   :  { %p1540_p2 = scmp.ne.s32.totalorder %s1864_s23, %s1539_s30  ;;  %p1545_p4 = scmp.lt.s32.totalorder %s1539_s30, %s1539_s30 }
 0x5d6   :  { %p1546_p5 = por %p1545_p4, %p1544_p3 }
 0x5d8   :  { %p1547_p6 = pnand %p1546_p5, %p1540_p2 }
 0x5da   :  { %1550 = shalt.err (!%p1547_p6)
}
 0x5db   :  { %s1913_s25 = sld [smem:[#allocation26_spill]] }
 0x5e1   :  { %s1551_s12 = scalar_lea.hbm %s1913_s25, 128 }
 0x5e2   :  { %p1552_p7 = scmp.ne.s32.totalorder %s1913_s25, %s1551_s12  ;;  %p1555_p8 = scmp.lt.u32.totalorder %s1551_s12, %s1913_s25 }
 0x5e4   :  { %p1557_p9 = pnand %p1555_p8, %p1552_p7 }
 0x5e6   :  { %1560 = shalt.err (!%p1557_p9)
}
 0x5e7   :  { %994 = dma.vmem_to_hbm [thread:$0]  %s1864_s23, 128, %s1913_s25, [#allocation18]  }
 0x5e8   :  { %1571 = dma.done.wait [#allocation4], 128  }
 0x5e9   :  { %1572 = vsyncadd [#allocation4], 4294967168 }
 0x5ea   :  { %1573 = dma.done.wait [#allocation18], 128  }
 0x5eb   :  { %1574 = vsyncadd [#allocation18], 4294967168 }
 0x5ec   :  { %1001 = vsyncpa [#allocation3], 1 }
 0x5ed   :  { %1002 = vsyncpa [#allocation6], 1 }
 0x5ee   :  { %1003 = vsyncpa [#allocation9], 1 }
 0x5ef   :  { %1004 = vsyncpa [#allocation12], 1 }
 0x5f0   :  { %1005 = vsyncpa [#allocation15], 1 }
 0x5f1   :  { %1006 = vsyncpa [#allocation4], 1 }
 0x5f2   :  { %1007 = vsyncpa [#allocation18], 1 }

// kernel: tpu_custom_call.1
= control target key start
LH: loop header
LB: loop body
LE: loop exit
PB: predicated region body
PF: predicated region fallthrough
CT: control target
= control target key end

     0   :  { %s1895_s0 = inlined_call_operand.hbm [shape: bf16[8,128], index: 0, kind: input, shape index: {}]   ;;  %s1896_s1 = inlined_call_operand.hbm [shape: bf16[128,128], index: 1, kind: input, shape index: {}]   ;;  %s1897_s2 = inlined_call_operand.vmem [shape: f32[1,128], index: 2, kind: input, shape index: {}]   ;;  %s1898_s3 = inlined_call_operand.hbm [shape: bf16[128,128], index: 3, kind: input, shape index: {}]   ;;  %s1899_s4 = inlined_call_operand.vmem [shape: f32[1,128], index: 4, kind: input, shape index: {}]   ;;  %s1900_s5 = inlined_call_operand.hbm [shape: bf16[128,128], index: 5, kind: input, shape index: {}]   ;;  %s1901_s6 = inlined_call_operand.vmem [shape: f32[1,128], index: 6, kind: input, shape index: {}]   ;;  %s1902_s7 = inlined_call_operand.hbm [shape: bf16[128,128], index: 7, kind: input, shape index: {}]   ;;  %s1903_s8 = inlined_call_operand.vmem [shape: f32[1,128], index: 8, kind: input, shape index: {}]   ;;  %s1904_s9 = inlined_call_operand.hbm [shape: bf16[128,256], index: 9, kind: input, shape index: {}]   ;;  %s1905_s10 = inlined_call_operand.hbm [shape: bf16[128,128], index: 10, kind: input, shape index: {}]   ;;  %s1906_s11 = inlined_call_operand.vmem [shape: f32[1,128], index: 11, kind: input, shape index: {}]   ;;  %s1907_s12 = inlined_call_operand.hbm [shape: bf16[128,128], index: 12, kind: input, shape index: {}]   ;;  %s1908_s13 = inlined_call_operand.vmem [shape: f32[1,128], index: 13, kind: input, shape index: {}]   ;;  %s1909_s14 = inlined_call_operand.hbm [shape: f32[8,128], index: 14, kind: output, shape index: {0}]   ;;  %s1910_s15 = inlined_call_operand.hbm [shape: f32[8,128], index: 15, kind: output, shape index: {1}]  }
   0x1   :  { %1912 = sst [smem:[#allocation26_spill]] %s1910_s15 }
   0x2   :  { %21 = vsyncpa [#allocation3], 0 }
   0x3   :  { %22 = vsyncpa [#allocation6], 0 }
   0x4   :  { %23 = vsyncpa [#allocation9], 0 }
   0x5   :  { %24 = vsyncpa [#allocation12], 0 }
   0x6   :  { %25 = vsyncpa [#allocation15], 0 }
   0x7   :  { %26 = vsyncpa [#allocation4], 0 }
   0x8   :  { %27 = vsyncpa [#allocation18], 0  ;;  %s1575_s18 = smov [#allocation5]   ;;  %s1341_s22 = scalar_lea.hbm %s1896_s1, 1024 }
   0x9   :  { %s43_s19 = sshll.u32 %s1575_s18, 4  ;;  %p1342_p0 = scmp.ne.s32.totalorder %s1896_s1, %s1341_s22  ;;  %s44_s19 = int_to_ptr.vmem [resolvable:$true] %s43_s19 }
   0xa   :  { %p1345_p1 = scmp.lt.u32.totalorder %s1341_s22, %s1896_s1 }
   0xc   :  { %p1347_p2 = pnand %p1345_p1, %p1342_p0 }
   0xe   :  { %1350 = shalt.err (!%p1347_p2)
}
   0xf   :  { %s1351_s27 = scalar_lea.vmem %s44_s19, 1024  ;;  %p1356_p4 = scmp.lt.s32.totalorder %s44_s19, %s44_s19 }
  0x10   :  { %p1352_p3 = scmp.ne.s32.totalorder %s44_s19, %s1351_s27  ;;  %p1357_p5 = scmp.lt.s32.totalorder %s1351_s27, %s1351_s27 }
  0x12   :  { %p1358_p6 = por %p1357_p5, %p1356_p4 }
  0x14   :  { %p1359_p7 = pnand %p1358_p6, %p1352_p3 }
  0x16   :  { %1362 = shalt.err (!%p1359_p7)
}
  0x17   :  { %s1576_s28 = smov 64   ;;  %s1577_s29 = smov 4  }
  0x18   :  { %49 = dma.hbm_to_vmem [thread:$0]  %s1896_s1, 1024, %s44_s19, [#allocation6], %s1576_s28, %s1576_s28, %s1577_s29  }
  0x19   :  { %s1578_s17 = smov [#allocation8]   ;;  %s1579_s20 = smov [#allocation11]  }
  0x1a   :  { %s71_s18 = sshll.u32 %s1578_s17, 4  ;;  %s99_s21 = sshll.u32 %s1579_s20, 4  ;;  %s72_s18 = int_to_ptr.vmem [resolvable:$true] %s71_s18  ;;  %s100_s21 = int_to_ptr.vmem [resolvable:$true] %s99_s21 }
  0x1b   :  { %s1363_s24 = scalar_lea.hbm %s1900_s5, 1024 }
  0x1c   :  { %p1364_p8 = scmp.ne.s32.totalorder %s1900_s5, %s1363_s24  ;;  %p1367_p9 = scmp.lt.u32.totalorder %s1363_s24, %s1900_s5 }
  0x1e   :  { %p1369_p10 = pnand %p1367_p9, %p1364_p8 }
  0x20   :  { %1372 = shalt.err (!%p1369_p10)
}
  0x21   :  { %s1373_s1 = scalar_lea.vmem %s72_s18, 1024  ;;  %p1378_p12 = scmp.lt.s32.totalorder %s72_s18, %s72_s18 }
  0x22   :  { %p1374_p11 = scmp.ne.s32.totalorder %s72_s18, %s1373_s1  ;;  %p1379_p13 = scmp.lt.s32.totalorder %s1373_s1, %s1373_s1 }
  0x24   :  { %p1380_p0 = por %p1379_p13, %p1378_p12 }
  0x26   :  { %p1381_p1 = pnand %p1380_p0, %p1374_p11 }
  0x28   :  { %1384 = shalt.err (!%p1381_p1)
}
  0x29   :  { %77 = dma.hbm_to_vmem [thread:$0]  %s1900_s5, 1024, %s72_s18, [#allocation9], %s1576_s28, %s1576_s28, %s1577_s29  }
  0x2a   :  { %s1385_s17 = scalar_lea.hbm %s1904_s9, 2048 }
  0x2b   :  { %p1386_p2 = scmp.ne.s32.totalorder %s1904_s9, %s1385_s17  ;;  %p1389_p3 = scmp.lt.u32.totalorder %s1385_s17, %s1904_s9 }
  0x2d   :  { %p1391_p4 = pnand %p1389_p3, %p1386_p2 }
  0x2f   :  { %1394 = shalt.err (!%p1391_p4)
}
  0x30   :  { %s1395_s25 = scalar_lea.vmem %s100_s21, 2048  ;;  %p1400_p6 = scmp.lt.s32.totalorder %s100_s21, %s100_s21 }
  0x31   :  { %p1396_p5 = scmp.ne.s32.totalorder %s100_s21, %s1395_s25  ;;  %p1401_p7 = scmp.lt.s32.totalorder %s1395_s25, %s1395_s25 }
  0x33   :  { %p1402_p8 = por %p1401_p7, %p1400_p6 }
  0x35   :  { %p1403_p9 = pnand %p1402_p8, %p1396_p5 }
  0x37   :  { %1406 = shalt.err (!%p1403_p9)
}
  0x38   :  { %s1580_s5 = smov 128   ;;  %s1581_s18 = smov 8  }
  0x39   :  { %105 = dma.hbm_to_vmem [thread:$0]  %s1904_s9, 2048, %s100_s21, [#allocation12], %s1580_s5, %s1580_s5, %s1581_s18  }
  0x3a   :  { %s1582_s1 = smov [#allocation2]   ;;  %s1583_s30 = smov [#allocation7]  }
  0x3b   :  { %s34_s19 = sshll.u32 %s1582_s1, 4  ;;  %s57_s16 = sshll.u32 %s1583_s30, 4  ;;  %s35_s19 = int_to_ptr.vmem [resolvable:$true] %s34_s19  ;;  %s58_s16 = int_to_ptr.vmem [resolvable:$true] %s57_s16 }
  0x3c   :  { %s1407_s20 = scalar_lea.hbm %s1895_s0, 64 }
  0x3d   :  { %p1408_p10 = scmp.ne.s32.totalorder %s1895_s0, %s1407_s20  ;;  %p1411_p11 = scmp.lt.u32.totalorder %s1407_s20, %s1895_s0 }
  0x3f   :  { %p1413_p12 = pnand %p1411_p11, %p1408_p10 }
  0x41   :  { %1416 = shalt.err (!%p1413_p12)
}
  0x42   :  { %s1417_s9 = scalar_lea.vmem %s35_s19, 64  ;;  %p1422_p0 = scmp.lt.s32.totalorder %s35_s19, %s35_s19 }
  0x43   :  { %p1418_p13 = scmp.ne.s32.totalorder %s35_s19, %s1417_s9  ;;  %p1423_p1 = scmp.lt.s32.totalorder %s1417_s9, %s1417_s9 }
  0x45   :  { %p1424_p2 = por %p1423_p1, %p1422_p0 }
  0x47   :  { %p1425_p3 = pnand %p1424_p2, %p1418_p13 }
  0x49   :  { %1428 = shalt.err (!%p1425_p3)
}
  0x4a   :  { %37 = dma.hbm_to_vmem [thread:$0]  %s1895_s0, 64, %s35_s19, [#allocation3]  }
  0x4b   :  { %s1429_s27 = scalar_lea.hbm %s1898_s3, 1024 }
  0x4c   :  { %p1430_p4 = scmp.ne.s32.totalorder %s1898_s3, %s1429_s27  ;;  %p1433_p5 = scmp.lt.u32.totalorder %s1429_s27, %s1898_s3 }
  0x4e   :  { %p1435_p6 = pnand %p1433_p5, %p1430_p4 }
  0x50   :  { %1438 = shalt.err (!%p1435_p6)
}
  0x51   :  { %s1439_s20 = scalar_lea.vmem %s58_s16, 1024  ;;  %p1444_p8 = scmp.lt.s32.totalorder %s58_s16, %s58_s16 }
  0x52   :  { %p1440_p7 = scmp.ne.s32.totalorder %s58_s16, %s1439_s20  ;;  %p1445_p9 = scmp.lt.s32.totalorder %s1439_s20, %s1439_s20 }
  0x54   :  { %p1446_p10 = por %p1445_p9, %p1444_p8 }
  0x56   :  { %p1447_p11 = pnand %p1446_p10, %p1440_p7 }
  0x58   :  { %1450 = shalt.err (!%p1447_p11)
}
  0x59   :  { %63 = dma.hbm_to_vmem [thread:$0]  %s1898_s3, 1024, %s58_s16, [#allocation6], %s1576_s28, %s1576_s28, %s1577_s29  }
  0x5a   :  { %s1584_s22 = smov [#allocation10]   ;;  %s1585_s24 = smov [#allocation13]  }
  0x5b   :  { %s85_s23 = sshll.u32 %s1584_s22, 4  ;;  %s111_s25 = sshll.u32 %s1585_s24, 4  ;;  %s86_s23 = int_to_ptr.vmem [resolvable:$true] %s85_s23  ;;  %s112_s25 = int_to_ptr.vmem [resolvable:$true] %s111_s25 }
  0x5c   :  { %s1451_s5 = scalar_lea.hbm %s1902_s7, 1024 }
  0x5d   :  { %p1452_p12 = scmp.ne.s32.totalorder %s1902_s7, %s1451_s5  ;;  %p1455_p13 = scmp.lt.u32.totalorder %s1451_s5, %s1902_s7 }
  0x5f   :  { %p1457_p0 = pnand %p1455_p13, %p1452_p12 }
  0x61   :  { %1460 = shalt.err (!%p1457_p0)
}
  0x62   :  { %s1461_s3 = scalar_lea.vmem %s86_s23, 1024  ;;  %p1466_p2 = scmp.lt.s32.totalorder %s86_s23, %s86_s23 }
  0x63   :  { %p1462_p1 = scmp.ne.s32.totalorder %s86_s23, %s1461_s3  ;;  %p1467_p3 = scmp.lt.s32.totalorder %s1461_s3, %s1461_s3 }
  0x65   :  { %p1468_p4 = por %p1467_p3, %p1466_p2 }
  0x67   :  { %p1469_p5 = pnand %p1468_p4, %p1462_p1 }
  0x69   :  { %1472 = shalt.err (!%p1469_p5)
}
  0x6a   :  { %91 = dma.hbm_to_vmem [thread:$0]  %s1902_s7, 1024, %s86_s23, [#allocation9], %s1576_s28, %s1576_s28, %s1577_s29  }
  0x6b   :  { %s1473_s20 = scalar_lea.hbm %s1905_s10, 1024 }
  0x6c   :  { %p1474_p6 = scmp.ne.s32.totalorder %s1905_s10, %s1473_s20  ;;  %p1477_p7 = scmp.lt.u32.totalorder %s1473_s20, %s1905_s10 }
  0x6e   :  { %p1479_p8 = pnand %p1477_p7, %p1474_p6 }
  0x70   :  { %1482 = shalt.err (!%p1479_p8)
}
  0x71   :  { %s1483_s9 = scalar_lea.vmem %s112_s25, 1024  ;;  %p1488_p10 = scmp.lt.s32.totalorder %s112_s25, %s112_s25 }
  0x72   :  { %p1484_p9 = scmp.ne.s32.totalorder %s112_s25, %s1483_s9  ;;  %p1489_p11 = scmp.lt.s32.totalorder %s1483_s9, %s1483_s9 }
  0x74   :  { %p1490_p12 = por %p1489_p11, %p1488_p10 }
  0x76   :  { %p1491_p13 = pnand %p1490_p12, %p1484_p9 }
  0x78   :  { %1494 = shalt.err (!%p1491_p13)
}
  0x79   :  { %117 = dma.hbm_to_vmem [thread:$0]  %s1905_s10, 1024, %s112_s25, [#allocation12], %s1576_s28, %s1576_s28, %s1577_s29  }
  0x7a   :  { %s1586_s21 = smov [#allocation14]   ;;  %s1495_s27 = scalar_lea.hbm %s1907_s12, 1024 }
  0x7b   :  { %s125_s5 = sshll.u32 %s1586_s21, 4  ;;  %p1496_p0 = scmp.ne.s32.totalorder %s1907_s12, %s1495_s27  ;;  %s126_s5 = int_to_ptr.vmem [resolvable:$true] %s125_s5 }
  0x7c   :  { %p1499_p1 = scmp.lt.u32.totalorder %s1495_s27, %s1907_s12 }
  0x7e   :  { %p1501_p2 = pnand %p1499_p1, %p1496_p0 }
  0x80   :  { %1504 = shalt.err (!%p1501_p2)
}
  0x81   :  { %s1505_s15 = scalar_lea.vmem %s126_s5, 1024  ;;  %p1510_p4 = scmp.lt.s32.totalorder %s126_s5, %s126_s5 }
  0x82   :  { %p1506_p3 = scmp.ne.s32.totalorder %s126_s5, %s1505_s15  ;;  %p1511_p5 = scmp.lt.s32.totalorder %s1505_s15, %s1505_s15 }
  0x84   :  { %p1512_p6 = por %p1511_p5, %p1510_p4 }
  0x86   :  { %p1513_p7 = pnand %p1512_p6, %p1506_p3 }
  0x88   :  { %1516 = shalt.err (!%p1513_p7)
}
  0x89   :  { %131 = dma.hbm_to_vmem [thread:$0]  %s1907_s12, 1024, %s126_s5, [#allocation15], %s1576_s28, %s1576_s28, %s1577_s29  }
  0x8a   :  { %1561 = dma.done.wait [#allocation3], 64  }
  0x8b   :  { %1562 = vsyncadd [#allocation3], 4294967232 }
  0x8c   :  { %1563 = dma.done.wait [#allocation6], 2048  }
  0x8d   :  { %1564 = vsyncadd [#allocation6], 4294965248 }
  0x8e   :  { %1565 = dma.done.wait [#allocation9], 2048  }
  0x8f   :  { %1566 = vsyncadd [#allocation9], 4294965248 }
  0x90   :  { %1567 = dma.done.wait [#allocation12], 3072  }
  0x91   :  { %1568 = vsyncadd [#allocation12], 4294964224 }
  0x92   :  { %1569 = dma.done.wait [#allocation15], 1024  }
  0x93   :  { %1570 = vsyncadd [#allocation15], 4294966272  ;;  %v1587_v0 = vmov 0.0   ;;  %vm1588_vm0 = vmmov 0   ;;  %v1269_v1 = vld [vmem:[#allocation5] sm:$0xff]   ;;  %v1270_v2 = vld [vmem:[#allocation5 + $0x8] sm:$0xff]  }
  0x94   :  { %1132 = vmatprep.subr.bf16.mxu0 %v1587_v0  ;;  %1148 = vmatprep.mubr.msk.bf16.mxu0 %vm1588_vm0, %v1587_v0  ;;  %v1271_v3 = vld [vmem:[#allocation5 + $0x10] sm:$0xff]   ;;  %v1277_v4 = vld [vmem:[#allocation7] sm:$0xff]   ;;  %v1272_v5 = vld [vmem:[#allocation5 + $0x18] sm:$0xff]   ;;  %s1590_s19 = smov [#allocation16]   ;;  %s1591_s7 = smov [#allocation17]  }
  0x95   :  { %1152 = vmatprep.subr.bf16.mxu1 %v1587_v0  ;;  %1168 = vmatprep.mubr.msk.bf16.mxu1 %vm1588_vm0, %v1587_v0  ;;  %v1278_v6 = vld [vmem:[#allocation7 + $0x8] sm:$0xff]   ;;  %v1273_v7 = vld [vmem:[#allocation5 + $0x20] sm:$0xff]   ;;  %v1279_v8 = vld [vmem:[#allocation7 + $0x10] sm:$0xff]   ;;  %s981_s22 = sshll.u32 %s1590_s19, 4  ;;  %s991_s23 = sshll.u32 %s1591_s7, 4  ;;  %s982_s22 = int_to_ptr.vmem [resolvable:$true] %s981_s22  ;;  %s1864_s23 = int_to_ptr.vmem [resolvable:$true] %s991_s23 }
  0x96   :  { %1133 = vmatpush3.bf16.msra.mxu0 %v1269_v1  ;;  %1153 = vmatpush3.bf16.msra.mxu1 %v1277_v4  ;;  %v1274_v9 = vld [vmem:[#allocation5 + $0x28] sm:$0xff]   ;;  %v1280_v10 = vld [vmem:[#allocation7 + $0x18] sm:$0xff]   ;;  %v1275_v11 = vld [vmem:[#allocation5 + $0x30] sm:$0xff]   ;;  %p1522_p9 = scmp.lt.s32.totalorder %s982_s22, %s982_s22 }
  0x97   :  { %1134 = vmatprep.subr.bf16.mxu0 %v1587_v0  ;;  %1154 = vmatprep.subr.bf16.mxu1 %v1587_v0  ;;  %v1281_v12 = vld [vmem:[#allocation7 + $0x20] sm:$0xff]   ;;  %v1276_v13 = vld [vmem:[#allocation5 + $0x38] sm:$0xff]   ;;  %v1282_v14 = vld [vmem:[#allocation7 + $0x28] sm:$0xff]  }
  0x98   :  { %v159_v15 = vld [vmem:[#allocation2] sm:$0xf]  ;;  %v1283_v16 = vld [vmem:[#allocation7 + $0x30] sm:$0xff]   ;;  %v1285_v18 = vld [vmem:[#allocation8] sm:$0xff]  }
  0x99   :  { %v1284_v17 = vld [vmem:[#allocation7 + $0x38] sm:$0xff]   ;;  %v1286_v19 = vld [vmem:[#allocation8 + $0x8] sm:$0xff]   ;;  %v1287_v20 = vld [vmem:[#allocation8 + $0x10] sm:$0xff]  }
  0x9a   :  { %1135 = vmatpush3.bf16.msra.mxu0 %v1270_v2  ;;  %1155 = vmatpush3.bf16.msra.mxu1 %v1278_v6  ;;  %v1288_v21 = vld [vmem:[#allocation8 + $0x18] sm:$0xff]   ;;  %v1289_v22 = vld [vmem:[#allocation8 + $0x20] sm:$0xff]   ;;  %v1290_v23 = vld [vmem:[#allocation8 + $0x28] sm:$0xff]  }
  0x9b   :  { %1136 = vmatprep.subr.bf16.mxu0 %v1587_v0  ;;  %1156 = vmatprep.subr.bf16.mxu1 %v1587_v0  ;;  %v1008_v24 = vld [vmem:[%s1897_s2] ss:$0 sm:$0xff]  ;;  %v1291_v32 = vld [vmem:[#allocation8 + $0x30] sm:$0xff]   ;;  %v1293_v34 = vld [vmem:[#allocation10] sm:$0xff]  }
  0x9c   :  { %v1292_v33 = vld [vmem:[#allocation8 + $0x38] sm:$0xff]   ;;  %v1294_v35 = vld [vmem:[#allocation10 + $0x8] sm:$0xff]   ;;  %v1295_v36 = vld [vmem:[#allocation10 + $0x10] sm:$0xff]  }
  0x9d   :  { %v1296_v37 = vld [vmem:[#allocation10 + $0x18] sm:$0xff]   ;;  %v1297_v38 = vld [vmem:[#allocation10 + $0x20] sm:$0xff]   ;;  %v1298_v39 = vld [vmem:[#allocation10 + $0x28] sm:$0xff]  }
  0x9e   :  { %1137 = vmatpush3.bf16.msra.mxu0 %v1271_v3  ;;  %1157 = vmatpush3.bf16.msra.mxu1 %v1279_v8  ;;  %v1017_v40 = vld [vmem:[%s1899_s4] ss:$0 sm:$0xff]  ;;  %v1299_v48 = vld [vmem:[#allocation10 + $0x30] sm:$0xff]   ;;  %v1301_v50 = vld [vmem:[#allocation11] ss:$8 sps:$4 sm:$0xff]  }
  0x9f   :  { %1138 = vmatprep.subr.bf16.mxu0 %v1587_v0  ;;  %1158 = vmatprep.subr.bf16.mxu1 %v1587_v0  ;;  %v1300_v49 = vld [vmem:[#allocation10 + $0x38] sm:$0xff]   ;;  %v1303_v51 = vld [vmem:[#allocation11 + $0x4] ss:$8 sps:$4 sm:$0xff]   ;;  %v1307_v55 = vld [vmem:[#allocation11 + $0x20] ss:$8 sps:$4 sm:$0xff]  }
  0xa0   :  { %v1306_v52 = vld [vmem:[#allocation11 + $0x14] ss:$8 sps:$4 sm:$0xff]   ;;  %v1304_v53 = vld [vmem:[#allocation11 + $0x10] ss:$8 sps:$4 sm:$0xff]   ;;  %v1309_v54 = vld [vmem:[#allocation11 + $0x24] ss:$8 sps:$4 sm:$0xff]  }
  0xa1   :  { %v1312_v56 = vld [vmem:[#allocation11 + $0x34] ss:$8 sps:$4 sm:$0xff]   ;;  %v1310_v57 = vld [vmem:[#allocation11 + $0x30] ss:$8 sps:$4 sm:$0xff]   ;;  %v1315_v58 = vld [vmem:[#allocation11 + $0x44] ss:$8 sps:$4 sm:$0xff]  }
  0xa2   :  { %1139 = vmatpush3.bf16.msra.mxu0 %v1272_v5  ;;  %1159 = vmatpush3.bf16.msra.mxu1 %v1280_v10  ;;  %v1313_v59 = vld [vmem:[#allocation11 + $0x40] ss:$8 sps:$4 sm:$0xff]   ;;  %v1318_v60 = vld [vmem:[#allocation11 + $0x54] ss:$8 sps:$4 sm:$0xff]   ;;  %v1316_v61 = vld [vmem:[#allocation11 + $0x50] ss:$8 sps:$4 sm:$0xff]  }
  0xa3   :  { %1140 = vmatprep.subr.bf16.mxu0 %v1587_v0  ;;  %1160 = vmatprep.subr.bf16.mxu1 %v1587_v0  ;;  %v1321_v62 = vld [vmem:[#allocation11 + $0x64] ss:$8 sps:$4 sm:$0xff]   ;;  %v1319_v63 = vld [vmem:[#allocation11 + $0x60] ss:$8 sps:$4 sm:$0xff]   ;;  %v1026_v1 = vld [vmem:[%s1901_s6] ss:$0 sm:$0xff] }
  0xa4   :  { %v1322_v10 = vld [vmem:[#allocation11 + $0x70] ss:$8 sps:$4 sm:$0xff]  }
  0xa6   :  { %1141 = vmatpush3.bf16.msra.mxu0 %v1273_v7  ;;  %1161 = vmatpush3.bf16.msra.mxu1 %v1281_v12  ;;  %v1325_v12 = vld [vmem:[#allocation13] sm:$0xff]  }
  0xa7   :  { %1142 = vmatprep.subr.bf16.mxu0 %v1587_v0  ;;  %1162 = vmatprep.subr.bf16.mxu1 %v1587_v0 }
  0xaa   :  { %1143 = vmatpush3.bf16.msra.mxu0 %v1274_v9  ;;  %1163 = vmatpush3.bf16.msra.mxu1 %v1282_v14  ;;  %v1324_v9 = vld [vmem:[#allocation11 + $0x74] ss:$8 sps:$4 sm:$0xff]  }
  0xab   :  { %1144 = vmatprep.subr.bf16.mxu0 %v1587_v0  ;;  %1164 = vmatprep.subr.bf16.mxu1 %v1587_v0  ;;  %v1329_v14 = vld [vmem:[#allocation13 + $0x10] sm:$0xff]  }
  0xae   :  { %1145 = vmatpush3.bf16.msra.mxu0 %v1275_v11  ;;  %1165 = vmatpush3.bf16.msra.mxu1 %v1283_v16  ;;  %v1589_v11 = vmov 0   ;;  %v1333_v16 = vld [vmem:[#allocation13 + $0x20] sm:$0xff]  }
  0xaf   :  { %1146 = vmatprep.subr.bf16.mxu0 %v1587_v0  ;;  %1166 = vmatprep.subr.bf16.mxu1 %v1587_v0 }
  0xb2   :  { %1147 = vmatpush3.bf16.msra.mxu0 %v1276_v13  ;;  %1167 = vmatpush3.bf16.msra.mxu1 %v1284_v17  ;;  %v1327_v13 = vld [vmem:[#allocation13 + $0x8] sm:$0xff]  }
  0xb3   :  { %1172 = vmatprep.subr.bf16.mxu0 %v1587_v0  ;;  %1192 = vmatprep.subr.bf16.mxu1 %v1587_v0  ;;  %v1335_v17 = vld [vmem:[#allocation13 + $0x28] sm:$0xff]  }
  0xb5   :  { %1149 = vmatmul.mubr.bf16.vlgmr.msra.gmra.mrb[0].mxu0 %v159_v15  ;;  %v1331_v15 = vld [vmem:[#allocation13 + $0x18] sm:$0xff]  }
  0xb6   :  { %1188 = vmatprep.mubr.msk.bf16.mxu0 %vm1588_vm0, %v1587_v0  ;;  %1173 = vmatpush3.bf16.msra.mxu0 %v1285_v18  ;;  %v1337_v18 = vld [vmem:[#allocation13 + $0x30] sm:$0xff]  }
  0xb7   :  { %1174 = vmatprep.subr.bf16.mxu0 %v1587_v0 }
  0xba   :  { %1175 = vmatpush3.bf16.msra.mxu0 %v1286_v19  ;;  %v1035_v19 = vld [vmem:[%s1903_s8] ss:$0 sm:$0xff] }
  0xbb   :  { %1176 = vmatprep.subr.bf16.mxu0 %v1587_v0 }
  0xbe   :  { %1177 = vmatpush3.bf16.msra.mxu0 %v1287_v20 }
  0xbf   :  { %1178 = vmatprep.subr.bf16.mxu0 %v1587_v0 }
  0xc2   :  { %1179 = vmatpush3.bf16.msra.mxu0 %v1288_v21 }
  0xc3   :  { %1180 = vmatprep.subr.bf16.mxu0 %v1587_v0 }
  0xc6   :  { %1181 = vmatpush3.bf16.msra.mxu0 %v1289_v22 }
  0xc7   :  { %1182 = vmatprep.subr.bf16.mxu0 %v1587_v0 }
  0xca   :  { %1183 = vmatpush3.bf16.msra.mxu0 %v1290_v23 }
  0xcb   :  { %1184 = vmatprep.subr.bf16.mxu0 %v1587_v0 }
  0xce   :  { %1185 = vmatpush3.bf16.msra.mxu0 %v1291_v32  ;;  %v1336_v32 = vld [vmem:[#allocation14 + $0x28] sm:$0xff]  }
  0xcf   :  { %1186 = vmatprep.subr.bf16.mxu0 %v1587_v0 }
  0xd2   :  { %1187 = vmatpush3.bf16.msra.mxu0 %v1292_v33  ;;  %v1338_v33 = vld [vmem:[#allocation14 + $0x30] sm:$0xff]  }
  0xd3   :  { %708 = vmatprep.subr.bf16.mxu0 %v1303_v51 }
 0x188   :  { %v265_v25 = vpop.f32.mrb[0].mxu0 }
 0x189   :  { %v266_v26 = vadd.f32 %v1008_v24, %v265_v25  ;;  %v1150_v27 = vpop.f32.mrb[1].mxu0 }
 0x18a   :  { %v268_v28 = vpop.f32.mrb[2].mxu0 }
 0x18b   :  { %v271_v29 = vmax.f32 %v266_v26, 0.0  ;;  %v1151_v30 = vpop.f32.mrb[3].mxu0  ;;  %v1326_v26 = vld [vmem:[#allocation14] sm:$0xff]   ;;  %v1328_v28 = vld [vmem:[#allocation14 + $0x8] sm:$0xff]  }
 0x18c   :  { %v1332_v30 = vld [vmem:[#allocation14 + $0x18] sm:$0xff]  }
 0x18d   :  { %v272_v31 = vpack.c.bf16 %v271_v29, %v271_v29  ;;  %v1330_v29 = vld [vmem:[#allocation14 + $0x10] sm:$0xff]  }
 0x18f   :  { %1169 = vmatmul.mubr.bf16.vlgmr.msra.gmra.mrb[0].mxu1 %v272_v31  ;;  %v1334_v31 = vld [vmem:[#allocation14 + $0x20] sm:$0xff]  }
 0x190   :  { %1208 = vmatprep.mubr.msk.bf16.mxu1 %vm1588_vm0, %v1587_v0  ;;  %1193 = vmatpush3.bf16.msra.mxu1 %v1293_v34  ;;  %v1339_v34 = vld [vmem:[#allocation13 + $0x38] sm:$0xff]  }
 0x191   :  { %1194 = vmatprep.subr.bf16.mxu1 %v1587_v0 }
 0x194   :  { %1195 = vmatpush3.bf16.msra.mxu1 %v1294_v35  ;;  %v1340_v35 = vld [vmem:[#allocation14 + $0x38] sm:$0xff]  }
 0x195   :  { %1196 = vmatprep.subr.bf16.mxu1 %v1587_v0 }
 0x198   :  { %1197 = vmatpush3.bf16.msra.mxu1 %v1295_v36 }
 0x199   :  { %1198 = vmatprep.subr.bf16.mxu1 %v1587_v0 }
 0x19c   :  { %1199 = vmatpush3.bf16.msra.mxu1 %v1296_v37 }
 0x19d   :  { %1200 = vmatprep.subr.bf16.mxu1 %v1587_v0 }
 0x1a0   :  { %1201 = vmatpush3.bf16.msra.mxu1 %v1297_v38 }
 0x1a1   :  { %1202 = vmatprep.subr.bf16.mxu1 %v1587_v0 }
 0x1a4   :  { %1203 = vmatpush3.bf16.msra.mxu1 %v1298_v39 }
 0x1a5   :  { %1204 = vmatprep.subr.bf16.mxu1 %v1587_v0 }
 0x1a8   :  { %1205 = vmatpush3.bf16.msra.mxu1 %v1299_v48 }
 0x1a9   :  { %1206 = vmatprep.subr.bf16.mxu1 %v1587_v0 }
 0x1ac   :  { %1207 = vmatpush3.bf16.msra.mxu1 %v1300_v49 }
 0x1ad   :  { %1212 = vmatprep.subr.bf16.mxu1 %v1587_v0 }
 0x262   :  { %v378_v41 = vpop.f32.mrb[0].mxu1 }
 0x263   :  { %v379_v42 = vadd.f32 %v1017_v40, %v378_v41  ;;  %v1170_v43 = vpop.f32.mrb[1].mxu1 }
 0x264   :  { %v381_v44 = vpop.f32.mrb[2].mxu1 }
 0x265   :  { %v384_v45 = vmax.f32 %v379_v42, 0.0  ;;  %v1171_v46 = vpop.f32.mrb[3].mxu1  ;;  %v1060_v42 = vld [vmem:[%s1906_s11] ss:$0 sm:$0xff]  ;;  %s1517_s11 = scalar_lea.vmem %s982_s22, 128 }
 0x266   :  { %p1518_p8 = scmp.ne.s32.totalorder %s982_s22, %s1517_s11  ;;  %p1523_p10 = scmp.lt.s32.totalorder %s1517_s11, %s1517_s11 }
 0x267   :  { %v385_v47 = vpack.c.bf16 %v384_v45, %v384_v45 }
 0x268   :  { %p1524_p11 = por %p1523_p10, %p1522_p9 }
 0x269   :  { %1189 = vmatmul.mubr.bf16.vlgmr.msra.gmra.mrb[4].mxu0 %v385_v47 }
 0x26a   :  { %709 = vmatpush1.bf16.msra.mxu0 %v1301_v50  ;;  %740 = vmatprep.mubr.bf16.mxu0 %v1589_v11  ;;  %p1525_p12 = pnand %p1524_p11, %p1518_p8 }
 0x26b   :  { %710 = vmatprep.subr.bf16.mxu0 %v1306_v52 }
 0x26e   :  { %711 = vmatpush1.bf16.msra.mxu0 %v1304_v53 }
 0x26f   :  { %712 = vmatprep.subr.bf16.mxu0 %v1309_v54 }
 0x272   :  { %713 = vmatpush1.bf16.msra.mxu0 %v1307_v55 }
 0x273   :  { %714 = vmatprep.subr.bf16.mxu0 %v1312_v56 }
 0x276   :  { %715 = vmatpush1.bf16.msra.mxu0 %v1310_v57 }
 0x277   :  { %716 = vmatprep.subr.bf16.mxu0 %v1315_v58 }
 0x27a   :  { %717 = vmatpush1.bf16.msra.mxu0 %v1313_v59 }
 0x27b   :  { %718 = vmatprep.subr.bf16.mxu0 %v1318_v60 }
 0x27e   :  { %719 = vmatpush1.bf16.msra.mxu0 %v1316_v61 }
 0x27f   :  { %720 = vmatprep.subr.bf16.mxu0 %v1321_v62 }
 0x282   :  { %721 = vmatpush1.bf16.msra.mxu0 %v1319_v63 }
 0x283   :  { %722 = vmatprep.subr.bf16.mxu0 %v1324_v9 }
 0x286   :  { %723 = vmatpush1.bf16.msra.mxu0 %v1322_v10 }
 0x287   :  { %1232 = vmatprep.subr.bf16.mxu0 %v1587_v0 }
 0x33c   :  { %v491_v2 = vpop.f32.mrb[4].mxu0 }
 0x33d   :  { %v492_v3 = vadd.f32 %v1026_v1, %v491_v2  ;;  %v1190_v4 = vpop.f32.mrb[5].mxu0 }
 0x33e   :  { %v494_v5 = vpop.f32.mrb[6].mxu0 }
 0x33f   :  { %v497_v6 = vmax.f32 %v492_v3, 0.0  ;;  %v1191_v7 = vpop.f32.mrb[7].mxu0 }
 0x341   :  { %v498_v8 = vpack.c.bf16 %v497_v6, %v497_v6 }
 0x343   :  { %1209 = vmatmul.mubr.bf16.vlgmr.msra.gmra.mrb[4].mxu1 %v498_v8 }
 0x344   :  { %1228 = vmatprep.mubr.msk.bf16.mxu1 %vm1588_vm0, %v1587_v0  ;;  %1213 = vmatpush3.bf16.msra.mxu1 %v1325_v12 }
 0x345   :  { %1214 = vmatprep.subr.bf16.mxu1 %v1587_v0 }
 0x348   :  { %1215 = vmatpush3.bf16.msra.mxu1 %v1327_v13 }
 0x349   :  { %1216 = vmatprep.subr.bf16.mxu1 %v1587_v0 }
 0x34c   :  { %1217 = vmatpush3.bf16.msra.mxu1 %v1329_v14 }
 0x34d   :  { %1218 = vmatprep.subr.bf16.mxu1 %v1587_v0 }
 0x350   :  { %1219 = vmatpush3.bf16.msra.mxu1 %v1331_v15 }
 0x351   :  { %1220 = vmatprep.subr.bf16.mxu1 %v1587_v0 }
 0x354   :  { %1221 = vmatpush3.bf16.msra.mxu1 %v1333_v16 }
 0x355   :  { %1222 = vmatprep.subr.bf16.mxu1 %v1587_v0 }
 0x358   :  { %1223 = vmatpush3.bf16.msra.mxu1 %v1335_v17 }
 0x359   :  { %1224 = vmatprep.subr.bf16.mxu1 %v1587_v0 }
 0x35c   :  { %1225 = vmatpush3.bf16.msra.mxu1 %v1337_v18 }
 0x35d   :  { %1226 = vmatprep.subr.bf16.mxu1 %v1587_v0 }
 0x360   :  { %1227 = vmatpush3.bf16.msra.mxu1 %v1339_v34 }
 0x416   :  { %v604_v20 = vpop.f32.mrb[4].mxu1 }
 0x417   :  { %v605_v21 = vadd.f32 %v1035_v19, %v604_v20  ;;  %v1210_v22 = vpop.f32.mrb[5].mxu1 }
 0x418   :  { %v607_v23 = vpop.f32.mrb[6].mxu1 }
 0x419   :  { %v610_v24 = vmax.f32 %v605_v21, 0.0  ;;  %v1211_v25 = vpop.f32.mrb[7].mxu1 }
 0x41b   :  { %v611_v27 = vpack.c.bf16 %v610_v24, %v610_v24 }
 0x41d   :  { %741 = vmatmul.mubr.bf16.vlgmr.msra.gmra.mrb[8].mxu0 %v611_v27 }
 0x41e   :  { %1233 = vmatpush3.bf16.msra.mxu0 %v1326_v26  ;;  %1248 = vmatprep.mubr.msk.bf16.mxu0 %vm1588_vm0, %v1587_v0 }
 0x41f   :  { %1234 = vmatprep.subr.bf16.mxu0 %v1587_v0 }
 0x422   :  { %1235 = vmatpush3.bf16.msra.mxu0 %v1328_v28 }
 0x423   :  { %1236 = vmatprep.subr.bf16.mxu0 %v1587_v0 }
 0x426   :  { %1237 = vmatpush3.bf16.msra.mxu0 %v1330_v29 }
 0x427   :  { %1238 = vmatprep.subr.bf16.mxu0 %v1587_v0 }
 0x42a   :  { %1239 = vmatpush3.bf16.msra.mxu0 %v1332_v30 }
 0x42b   :  { %1240 = vmatprep.subr.bf16.mxu0 %v1587_v0 }
 0x42e   :  { %1241 = vmatpush3.bf16.msra.mxu0 %v1334_v31 }
 0x42f   :  { %1242 = vmatprep.subr.bf16.mxu0 %v1587_v0 }
 0x432   :  { %1243 = vmatpush3.bf16.msra.mxu0 %v1336_v32 }
 0x433   :  { %1244 = vmatprep.subr.bf16.mxu0 %v1587_v0 }
 0x436   :  { %1245 = vmatpush3.bf16.msra.mxu0 %v1338_v33 }
 0x437   :  { %1246 = vmatprep.subr.bf16.mxu0 %v1587_v0  ;;  %v1069_v0 = vld [vmem:[%s1908_s13] ss:$0 sm:$0xff] }
 0x43a   :  { %1247 = vmatpush3.bf16.msra.mxu0 %v1340_v35 }
 0x4f0   :  { %v742_v36 = vpop.f32.mrb[8].mxu0 }
 0x4f1   :  { %v749_v37 = vpack.c.bf16 %v742_v36, %v742_v36  ;;  %v744_v38 = vpop.f32.mrb[9].mxu0 }
 0x4f2   :  { %v750_v39 = vpack.c.bf16 %v744_v38, %v744_v38  ;;  %v746_v40 = vpop.f32.mrb[10].mxu0 }
 0x4f3   :  { %v747_v41 = vpop.f32.mrb[11].mxu0  ;;  %1229 = vmatmul.mubr.bf16.vlgmr.msra.gmra.mrb[8].mxu1 %v749_v37 }
 0x4f4   :  { %1249 = vmatmul.mubr.bf16.vlgmr.msra.gmra.mrb[12].mxu0 %v750_v39 }
 0x5c6   :  { %v856_v43 = vpop.f32.mrb[8].mxu1 }
 0x5c7   :  { %v857_v44 = vadd.f32 %v1060_v42, %v856_v43  ;;  %v1230_v45 = vpop.f32.mrb[9].mxu1  ;;  %v967_v46 = vpop.f32.mrb[12].mxu0 }
 0x5c8   :  { %v968_v47 = vadd.f32 %v1069_v0, %v967_v46  ;;  %v859_v48 = vpop.f32.mrb[10].mxu1  ;;  %v1250_v49 = vpop.f32.mrb[13].mxu0 }
 0x5c9   :  { %973 = vst [vmem:[#allocation16] sm:$0xff] %v857_v44  ;;  %v1231_v50 = vpop.f32.mrb[11].mxu1  ;;  %v970_v51 = vpop.f32.mrb[14].mxu0 }
 0x5ca   :  { %974 = vst [vmem:[#allocation17] sm:$0xff] %v968_v47  ;;  %v1251_v52 = vpop.f32.mrb[15].mxu0 }
 0x5cb   :  { %1528 = shalt.err (!%p1525_p12)
}
 0x5cc   :  { %s1529_s5 = scalar_lea.hbm %s1909_s14, 128 }
 0x5cd   :  { %p1530_p13 = scmp.ne.s32.totalorder %s1909_s14, %s1529_s5  ;;  %p1533_p0 = scmp.lt.u32.totalorder %s1529_s5, %s1909_s14 }
 0x5cf   :  { %p1535_p1 = pnand %p1533_p0, %p1530_p13 }
 0x5d1   :  { %1538 = shalt.err (!%p1535_p1)
}
 0x5d2   :  { %984 = dma.vmem_to_hbm [thread:$0]  %s982_s22, 128, %s1909_s14, [#allocation4]  }
 0x5d3   :  { %s1539_s30 = scalar_lea.vmem %s1864_s23, 128  ;;  %p1544_p3 = scmp.lt.s32.totalorder %s1864_s23, %s1864_s23 }
 0x5d4   :  { %p1540_p2 = scmp.ne.s32.totalorder %s1864_s23, %s1539_s30  ;;  %p1545_p4 = scmp.lt.s32.totalorder %s1539_s30, %s1539_s30 }
 0x5d6   :  { %p1546_p5 = por %p1545_p4, %p1544_p3 }
 0x5d8   :  { %p1547_p6 = pnand %p1546_p5, %p1540_p2 }
 0x5da   :  { %1550 = shalt.err (!%p1547_p6)
}
 0x5db   :  { %s1913_s25 = sld [smem:[#allocation26_spill]] }
 0x5e1   :  { %s1551_s12 = scalar_lea.hbm %s1913_s25, 128 }
 0x5e2   :  { %p1552_p7 = scmp.ne.s32.totalorder %s1913_s25, %s1551_s12  ;;  %p1555_p8 = scmp.lt.u32.totalorder %s1551_s12, %s1913_s25 }
 0x5e4   :  { %p1557_p9 = pnand %p1555_p8, %p1552_p7 }
 0x5e6   :  { %1560 = shalt.err (!%p1557_p9)
}
 0x5e7   :  { %994 = dma.vmem_to_hbm [thread:$0]  %s1864_s23, 128, %s1913_s25, [#allocation18]  }
 0x5e8   :  { %1571 = dma.done.wait [#allocation4], 128  }
 0x5e9   :  { %1572 = vsyncadd [#allocation4], 4294967168 }
 0x5ea   :  { %1573 = dma.done.wait [#allocation18], 128  }
 0x5eb   :  { %1574 = vsyncadd [#allocation18], 4294967168 }
 0x5ec   :  { %1001 = vsyncpa [#allocation3], 1 }
 0x5ed   :  { %1002 = vsyncpa [#allocation6], 1 }
 0x5ee   :  { %1003 = vsyncpa [#allocation9], 1 }
 0x5ef   :  { %1004 = vsyncpa [#allocation12], 1 }
 0x5f0   :  { %1005 = vsyncpa [#allocation15], 1 }
 0x5f1   :  { %1006 = vsyncpa [#allocation4], 1 }
 0x5f2   :  { %1007 = vsyncpa [#allocation18], 1 }

</bundles_post_ra>
